<compile_context>
chip_gen: v6e
topology: v6e:2x2x1
jax: 0.10.0
libtpu: 0.0.40
codegen_flags: <defaults>
</compile_context>

<pallas_src>
import jax
import jax.numpy as jnp
from jax.experimental import pallas as pl
from jax.experimental.pallas import tpu as pltpu

IN_DIM = 28 * 28          # 784 (kept un-padded; full-dim blocks are legal)
HID = 512
LAT_PAD = 128             # latent lanes padded to one full vreg
HEAD_PAD = 2 * LAT_PAD    # packed [u | 0 | logstd | 0] head width


def _round_up(x, m):
    return ((x + m - 1) // m) * m


def vae_kernel(x_ref, eps_ref,
               w1_ref, b1_ref,
               w2_ref, b2_ref,        # fused, vreg-aligned [w2u | 0 | w2s | 0]
               w3_ref, b3_ref,        # (LAT_PAD, HID), zero rows past code_len
               w4_ref, b4_ref,
               out_ref, ul_ref):
    bf16 = jnp.bfloat16

    x = x_ref[...]                                              # (TB, 784) bf16

    # encode: relu(x @ W1 + b1)
    h1 = jnp.dot(x, w1_ref[...],
                 preferred_element_type=jnp.float32) + b1_ref[...]
    h1 = jnp.maximum(h1, 0.0)                                   # (TB, 512) f32

    # fused heads: [u | 0 | logstd | 0] in one lane-full matmul
    ul = jnp.dot(h1.astype(bf16), w2_ref[...],
                 preferred_element_type=jnp.float32) + b2_ref[...]   # (TB, 256) f32

    u = ul[:, :LAT_PAD]                                         # whole-vreg slices
    logstd = ul[:, LAT_PAD:HEAD_PAD]

    # reparametrize (training mode): z = u + exp(logstd) * eps
    z = u + jnp.exp(logstd) * eps_ref[...]                      # (TB, 128) f32

    # decode
    h3 = jnp.dot(z.astype(bf16), w3_ref[...],
                 preferred_element_type=jnp.float32) + b3_ref[...]
    h3 = jnp.maximum(h3, 0.0)                                   # (TB, 512) f32

    h4 = jnp.dot(h3.astype(bf16), w4_ref[...],
                 preferred_element_type=jnp.float32) + b4_ref[...]   # (TB, 784) f32

    out_ref[...] = jax.nn.sigmoid(h4).astype(out_ref.dtype)     # lane store (last vreg masked)
    ul_ref[...] = ul.astype(ul_ref.dtype)                       # packed [u|0|logstd|0] store


def prepare_kernel_params(params):
    """One-time fuse/pad/cast of PyTorch-equivalent params into the kernel
    layout.  Call once and reuse the result across forward calls."""
    code = params["w2u"].shape[1]
    assert code <= LAT_PAD, "code_len must be <= 128"
    bf16 = jnp.bfloat16
    f32 = jnp.float32
    pad = LAT_PAD - code

    w1 = params["w1"].astype(bf16)                               # (784, 512)
    b1 = params["b1"].astype(f32)

    # vreg-aligned fused head: [w2u | 0 | w2s | 0] -> (512, 256)
    zc = jnp.zeros((HID, pad), f32)
    w2 = jnp.concatenate([params["w2u"], zc, params["w2s"], zc], axis=1).astype(bf16)
    zb = jnp.zeros((1, pad), f32)
    b2 = jnp.concatenate([params["b2u"], zb, params["b2s"], zb], axis=1).astype(f32)

    # decoder entry: K padded to a full 128 lanes (zero rows past code_len)
    w3 = jnp.pad(params["w3"], ((0, pad), (0, 0))).astype(bf16)  # (128, 512)
    b3 = params["b3"].astype(f32)

    w4 = params["w4"].astype(bf16)                               # (512, 784)
    b4 = params["b4"].astype(f32)

    return dict(w1=w1, b1=b1, w2=w2, b2=b2, w3=w3, b3=b3, w4=w4, b4=b4)


def _pick_tiling(B, tb):
    """Batch-tile size and tile count.  Targets ~512-row tiles and uses >=2
    tiles (megacore sharding on v7x) whenever each tile keeps >=128 rows."""
    if tb is not None:
        return tb, pl.cdiv(B, tb)
    n = max(1, pl.cdiv(B, 512))
    if n == 1 and B >= 256:
        n = 2
    if n == 1:
        return _round_up(max(B, 1), 8), 1       # single full-array block
    return _round_up(pl.cdiv(B, n), 16), n      # bf16-friendly sublane multiple


def _vae_forward(x, eps, kp, *, code_len, tb=None):
    """x: (B, 784) (bf16 preferred), eps: (B, code_len) f32,
    kp: output of prepare_kernel_params()."""
    B = x.shape[0]
    tb, n_tiles = _pick_tiling(B, tb)
    b_pad = tb * n_tiles

    x = x.astype(jnp.bfloat16)          # no-op if the caller already supplies bf16
    eps = eps.astype(jnp.float32)
    eps = jnp.pad(eps, ((0, b_pad - B), (0, LAT_PAD - code_len)))
    if b_pad != B:
        x = jnp.pad(x, ((0, b_pad - B), (0, 0)))

    grid_spec = pltpu.PrefetchScalarGridSpec(
        num_scalar_prefetch=0,
        grid=(n_tiles,),
        in_specs=[
            pl.BlockSpec((tb, IN_DIM), lambda i: (i, 0)),       # x (batch-tiled, bf16)
            pl.BlockSpec((tb, LAT_PAD), lambda i: (i, 0)),      # eps (batch-tiled)
            pl.BlockSpec((IN_DIM, HID), lambda i: (0, 0)),      # w1 (resident)
            pl.BlockSpec((1, HID), lambda i: (0, 0)),           # b1
            pl.BlockSpec((HID, HEAD_PAD), lambda i: (0, 0)),    # w2 (fused heads)
            pl.BlockSpec((1, HEAD_PAD), lambda i: (0, 0)),      # b2
            pl.BlockSpec((LAT_PAD, HID), lambda i: (0, 0)),     # w3 (K padded to 128)
            pl.BlockSpec((1, HID), lambda i: (0, 0)),           # b3
            pl.BlockSpec((HID, IN_DIM), lambda i: (0, 0)),      # w4
            pl.BlockSpec((1, IN_DIM), lambda i: (0, 0)),        # b4
        ],
        out_specs=[
            pl.BlockSpec((tb, IN_DIM), lambda i: (i, 0)),       # reconstruction
            pl.BlockSpec((tb, HEAD_PAD), lambda i: (i, 0)),     # packed [u|0|logstd|0]
        ],
    )

    out, ul = pl.pallas_call(
        vae_kernel,
        out_shape=(
            jax.ShapeDtypeStruct((b_pad, IN_DIM), jnp.float32),
            jax.ShapeDtypeStruct((b_pad, HEAD_PAD), jnp.float32),
        ),
        grid_spec=grid_spec,
        compiler_params=pltpu.CompilerParams(
            dimension_semantics=("parallel",),     # megacore sharding on v7x
            vmem_limit_bytes=32 << 20,
        ),
    )(x, eps,
      kp["w1"], kp["b1"], kp["w2"], kp["b2"],
      kp["w3"], kp["b3"], kp["w4"], kp["b4"])

    if b_pad != B:
        out = out[:B]
        ul = ul[:B]
    u = ul[:, :code_len]
    logstd = ul[:, LAT_PAD:LAT_PAD + code_len]
    return out, u, logstd


vae_forward = jax.jit(_vae_forward, static_argnames=("code_len", "tb"))


def init_params(key, code_len):
    """Deterministic synthetic parameters, PyTorch-Linear-equivalent init,
    stored transposed as (in, out) for the kernel."""
    def linear(key, fan_in, fan_out):
        kw, kb = jax.random.split(key)
        bound = 1.0 / jnp.sqrt(fan_in)
        w = jax.random.uniform(kw, (fan_in, fan_out), jnp.float32, -bound, bound)
        b = jax.random.uniform(kb, (1, fan_out), jnp.float32, -bound, bound)
        return w, b

    k1, k2, k3, k4, k5 = jax.random.split(key, 5)
    w1, b1 = linear(k1, IN_DIM, HID)
    w2u, b2u = linear(k2, HID, code_len)
    w2s, b2s = linear(k3, HID, code_len)
    w3, b3 = linear(k4, code_len, HID)
    w4, b4 = linear(k5, HID, IN_DIM)
    return dict(w1=w1, b1=b1, w2u=w2u, b2u=b2u, w2s=w2s, b2s=b2s,
                w3=w3, b3=b3, w4=w4, b4=b4)


if __name__ == "__main__":
    B = 8
    CODE_LEN = 32

    key = jax.random.PRNGKey(0)
    k_params, k_x, k_eps = jax.random.split(key, 3)

    params = init_params(k_params, CODE_LEN)
    kp = prepare_kernel_params(params)      # hoisted: prepared once, reused every call

    x = jax.random.uniform(k_x, (B, IN_DIM), jnp.float32)        # "image" batch, flattened
    # TODO(synk): torch.randn_like draws noise inside the module; here eps is an explicit input.
    eps = jax.random.normal(k_eps, (B, CODE_LEN), jnp.float32)   # reparametrization noise

    x_bf16 = x.astype(jnp.bfloat16)          # bf16 at the HBM boundary (MXU operand dtype)

    out, u, logstd = vae_forward(x_bf16, eps, kp, code_len=CODE_LEN)
    jax.block_until_ready((out, u, logstd))

    # reference mirroring the kernel's bf16-operand / f32-accumulate matmuls
    def ref(x, eps, p):
        bf16 = jnp.bfloat16
        def mm(a, w):
            return jnp.dot(a.astype(bf16), w.astype(bf16),
                           preferred_element_type=jnp.float32)
        h1 = jnp.maximum(mm(x, p["w1"]) + p["b1"], 0.0)
        u = mm(h1, p["w2u"]) + p["b2u"]
        ls = mm(h1, p["w2s"]) + p["b2s"]
        z = u + jnp.exp(ls) * eps
        h3 = jnp.maximum(mm(z, p["w3"]) + p["b3"], 0.0)
        return jax.nn.sigmoid(mm(h3, p["w4"]) + p["b4"]), u, ls

    r_out, r_u, r_ls = ref(x, eps, params)
    assert jnp.allclose(out, r_out, atol=2e-3, rtol=2e-3)
    assert jnp.allclose(u, r_u, atol=2e-3, rtol=2e-3)
    assert jnp.allclose(logstd, r_ls, atol=2e-3, rtol=2e-3)

    print("KERNEL_OK")
</pallas_src>

<mosaic_0001>
module attributes {stable_mosaic.version = 11 : i64} {
  func.func @vae_kernel(%arg0: i32, %arg1: memref<8x784xbf16, #tpu.memory_space<vmem>>, %arg2: memref<8x128xf32, #tpu.memory_space<vmem>>, %arg3: memref<784x512xbf16, #tpu.memory_space<vmem>>, %arg4: memref<1x512xf32, #tpu.memory_space<vmem>>, %arg5: memref<512x256xbf16, #tpu.memory_space<vmem>>, %arg6: memref<1x256xf32, #tpu.memory_space<vmem>>, %arg7: memref<128x512xbf16, #tpu.memory_space<vmem>>, %arg8: memref<1x512xf32, #tpu.memory_space<vmem>>, %arg9: memref<512x784xbf16, #tpu.memory_space<vmem>>, %arg10: memref<1x784xf32, #tpu.memory_space<vmem>>, %arg11: memref<8x784xf32, #tpu.memory_space<vmem>>, %arg12: memref<8x256xf32, #tpu.memory_space<vmem>>) attributes {dimension_semantics = [#tpu.dimension_semantics<parallel>], iteration_bounds = array<i64: 1>, scalar_prefetch = 0 : i64, scratch_operands = 0 : i64, tpu.core_type = #tpu.core_type<tc>, window_params = [{transform_indices = @transform_0, window_bounds = array<i64: 8, 784>}, {transform_indices = @transform_1, window_bounds = array<i64: 8, 128>}, {pipeline_mode = #tpu.pipeline_mode<synchronous>, transform_indices = @transform_2, window_bounds = array<i64: 784, 512>}, {pipeline_mode = #tpu.pipeline_mode<synchronous>, transform_indices = @transform_3, window_bounds = array<i64: 1, 512>}, {pipeline_mode = #tpu.pipeline_mode<synchronous>, transform_indices = @transform_4, window_bounds = array<i64: 512, 256>}, {pipeline_mode = #tpu.pipeline_mode<synchronous>, transform_indices = @transform_5, window_bounds = array<i64: 1, 256>}, {pipeline_mode = #tpu.pipeline_mode<synchronous>, transform_indices = @transform_6, window_bounds = array<i64: 128, 512>}, {pipeline_mode = #tpu.pipeline_mode<synchronous>, transform_indices = @transform_7, window_bounds = array<i64: 1, 512>}, {pipeline_mode = #tpu.pipeline_mode<synchronous>, transform_indices = @transform_8, window_bounds = array<i64: 512, 784>}, {pipeline_mode = #tpu.pipeline_mode<synchronous>, transform_indices = @transform_9, window_bounds = array<i64: 1, 784>}, {transform_indices = @transform_10, window_bounds = array<i64: 8, 784>}, {transform_indices = @transform_11, window_bounds = array<i64: 8, 256>}]} {
    %c0 = arith.constant 0 : index
    %c0_0 = arith.constant 0 : index
    %0 = vector.load %arg1[%c0, %c0_0] : memref<8x784xbf16, #tpu.memory_space<vmem>>, vector<8x784xbf16>
    %c0_1 = arith.constant 0 : index
    %c0_2 = arith.constant 0 : index
    %1 = vector.load %arg3[%c0_1, %c0_2] : memref<784x512xbf16, #tpu.memory_space<vmem>>, vector<784x512xbf16>
    %cst = arith.constant dense<0.000000e+00> : vector<8x512xf32>
    %2 = tpu.matmul %0, %1, %cst {dimension_numbers = #tpu.dot_dimension_numbers<[1], [0], [0], [1], [0, 0, 1, 1], [], []>} : vector<8x784xbf16>, vector<784x512xbf16>, vector<8x512xf32> -> vector<8x512xf32>
    %c0_3 = arith.constant 0 : index
    %c0_4 = arith.constant 0 : index
    %3 = vector.load %arg4[%c0_3, %c0_4] : memref<1x512xf32, #tpu.memory_space<vmem>>, vector<1x512xf32>
    %4 = vector.broadcast %3 : vector<1x512xf32> to vector<8x512xf32>
    %5 = arith.addf %2, %4 : vector<8x512xf32>
    %cst_5 = arith.constant 0.000000e+00 : f32
    %6 = vector.broadcast %cst_5 : f32 to vector<8x512xf32>
    %7 = arith.maximumf %5, %6 : vector<8x512xf32>
    %8 = arith.truncf %7 : vector<8x512xf32> to vector<8x512xbf16>
    %c0_6 = arith.constant 0 : index
    %c0_7 = arith.constant 0 : index
    %9 = vector.load %arg5[%c0_6, %c0_7] : memref<512x256xbf16, #tpu.memory_space<vmem>>, vector<512x256xbf16>
    %cst_8 = arith.constant dense<0.000000e+00> : vector<8x256xf32>
    %10 = tpu.matmul %8, %9, %cst_8 {dimension_numbers = #tpu.dot_dimension_numbers<[1], [0], [0], [1], [0, 0, 1, 1], [], []>} : vector<8x512xbf16>, vector<512x256xbf16>, vector<8x256xf32> -> vector<8x256xf32>
    %c0_9 = arith.constant 0 : index
    %c0_10 = arith.constant 0 : index
    %11 = vector.load %arg6[%c0_9, %c0_10] : memref<1x256xf32, #tpu.memory_space<vmem>>, vector<1x256xf32>
    %12 = vector.broadcast %11 : vector<1x256xf32> to vector<8x256xf32>
    %13 = arith.addf %10, %12 : vector<8x256xf32>
    %14 = vector.extract_strided_slice %13 {offsets = [0, 0], sizes = [8, 128], strides = [1, 1]} : vector<8x256xf32> to vector<8x128xf32>
    %15 = vector.extract_strided_slice %13 {offsets = [0, 128], sizes = [8, 128], strides = [1, 1]} : vector<8x256xf32> to vector<8x128xf32>
    %16 = math.exp %15 : vector<8x128xf32>
    %c0_11 = arith.constant 0 : index
    %c0_12 = arith.constant 0 : index
    %17 = vector.load %arg2[%c0_11, %c0_12] : memref<8x128xf32, #tpu.memory_space<vmem>>, vector<8x128xf32>
    %18 = arith.mulf %16, %17 : vector<8x128xf32>
    %19 = arith.addf %14, %18 : vector<8x128xf32>
    %20 = arith.truncf %19 : vector<8x128xf32> to vector<8x128xbf16>
    %c0_13 = arith.constant 0 : index
    %c0_14 = arith.constant 0 : index
    %21 = vector.load %arg7[%c0_13, %c0_14] : memref<128x512xbf16, #tpu.memory_space<vmem>>, vector<128x512xbf16>
    %cst_15 = arith.constant dense<0.000000e+00> : vector<8x512xf32>
    %22 = tpu.matmul %20, %21, %cst_15 {dimension_numbers = #tpu.dot_dimension_numbers<[1], [0], [0], [1], [0, 0, 1, 1], [], []>} : vector<8x128xbf16>, vector<128x512xbf16>, vector<8x512xf32> -> vector<8x512xf32>
    %c0_16 = arith.constant 0 : index
    %c0_17 = arith.constant 0 : index
    %23 = vector.load %arg8[%c0_16, %c0_17] : memref<1x512xf32, #tpu.memory_space<vmem>>, vector<1x512xf32>
    %24 = vector.broadcast %23 : vector<1x512xf32> to vector<8x512xf32>
    %25 = arith.addf %22, %24 : vector<8x512xf32>
    %cst_18 = arith.constant 0.000000e+00 : f32
    %26 = vector.broadcast %cst_18 : f32 to vector<8x512xf32>
    %27 = arith.maximumf %25, %26 : vector<8x512xf32>
    %28 = arith.truncf %27 : vector<8x512xf32> to vector<8x512xbf16>
    %c0_19 = arith.constant 0 : index
    %c0_20 = arith.constant 0 : index
    %29 = vector.load %arg9[%c0_19, %c0_20] : memref<512x784xbf16, #tpu.memory_space<vmem>>, vector<512x784xbf16>
    %cst_21 = arith.constant dense<0.000000e+00> : vector<8x784xf32>
    %30 = tpu.matmul %28, %29, %cst_21 {dimension_numbers = #tpu.dot_dimension_numbers<[1], [0], [0], [1], [0, 0, 1, 1], [], []>} : vector<8x512xbf16>, vector<512x784xbf16>, vector<8x784xf32> -> vector<8x784xf32>
    %c0_22 = arith.constant 0 : index
    %c0_23 = arith.constant 0 : index
    %31 = vector.load %arg10[%c0_22, %c0_23] : memref<1x784xf32, #tpu.memory_space<vmem>>, vector<1x784xf32>
    %32 = vector.broadcast %31 : vector<1x784xf32> to vector<8x784xf32>
    %33 = arith.addf %30, %32 : vector<8x784xf32>
    %34 = arith.negf %33 : vector<8x784xf32>
    %35 = math.exp %34 : vector<8x784xf32>
    %cst_24 = arith.constant 1.000000e+00 : f32
    %36 = vector.broadcast %cst_24 : f32 to vector<8x784xf32>
    %37 = arith.addf %36, %35 : vector<8x784xf32>
    %38 = arith.divf %36, %37 : vector<8x784xf32>
    %c0_25 = arith.constant 0 : index
    %c0_26 = arith.constant 0 : index
    %39 = vector.load %arg11[%c0_25, %c0_26] : memref<8x784xf32, #tpu.memory_space<vmem>>, vector<8x784xf32>
    tpu.vector_store %arg11[%c0_25, %c0_26], %38 {strides = array<i32>} : memref<8x784xf32, #tpu.memory_space<vmem>>, vector<8x784xf32>,
    %c0_27 = arith.constant 0 : index
    %c0_28 = arith.constant 0 : index
    %40 = vector.load %arg12[%c0_27, %c0_28] : memref<8x256xf32, #tpu.memory_space<vmem>>, vector<8x256xf32>
    tpu.vector_store %arg12[%c0_27, %c0_28], %13 {strides = array<i32>} : memref<8x256xf32, #tpu.memory_space<vmem>>, vector<8x256xf32>,
    return
  }
  func.func @transform_0(%arg0: i32) -> (i32, i32) {
    %c0_i32 = arith.constant 0 : i32
    %c0_i32_0 = arith.constant 0 : i32
    return %arg0, %c0_i32 : i32, i32
  }
  func.func @transform_1(%arg0: i32) -> (i32, i32) {
    %c0_i32 = arith.constant 0 : i32
    %c0_i32_0 = arith.constant 0 : i32
    return %arg0, %c0_i32 : i32, i32
  }
  func.func @transform_2(%arg0: i32) -> (i32, i32) {
    %c0_i32 = arith.constant 0 : i32
    %c0_i32_0 = arith.constant 0 : i32
    %c0_i32_1 = arith.constant 0 : i32
    return %c0_i32, %c0_i32_0 : i32, i32
  }
  func.func @transform_3(%arg0: i32) -> (i32, i32) {
    %c0_i32 = arith.constant 0 : i32
    %c0_i32_0 = arith.constant 0 : i32
    %c0_i32_1 = arith.constant 0 : i32
    return %c0_i32, %c0_i32_0 : i32, i32
  }
  func.func @transform_4(%arg0: i32) -> (i32, i32) {
    %c0_i32 = arith.constant 0 : i32
    %c0_i32_0 = arith.constant 0 : i32
    %c0_i32_1 = arith.constant 0 : i32
    return %c0_i32, %c0_i32_0 : i32, i32
  }
  func.func @transform_5(%arg0: i32) -> (i32, i32) {
    %c0_i32 = arith.constant 0 : i32
    %c0_i32_0 = arith.constant 0 : i32
    %c0_i32_1 = arith.constant 0 : i32
    return %c0_i32, %c0_i32_0 : i32, i32
  }
  func.func @transform_6(%arg0: i32) -> (i32, i32) {
    %c0_i32 = arith.constant 0 : i32
    %c0_i32_0 = arith.constant 0 : i32
    %c0_i32_1 = arith.constant 0 : i32
    return %c0_i32, %c0_i32_0 : i32, i32
  }
  func.func @transform_7(%arg0: i32) -> (i32, i32) {
    %c0_i32 = arith.constant 0 : i32
    %c0_i32_0 = arith.constant 0 : i32
    %c0_i32_1 = arith.constant 0 : i32
    return %c0_i32, %c0_i32_0 : i32, i32
  }
  func.func @transform_8(%arg0: i32) -> (i32, i32) {
    %c0_i32 = arith.constant 0 : i32
    %c0_i32_0 = arith.constant 0 : i32
    %c0_i32_1 = arith.constant 0 : i32
    return %c0_i32, %c0_i32_0 : i32, i32
  }
  func.func @transform_9(%arg0: i32) -> (i32, i32) {
    %c0_i32 = arith.constant 0 : i32
    %c0_i32_0 = arith.constant 0 : i32
    %c0_i32_1 = arith.constant 0 : i32
    return %c0_i32, %c0_i32_0 : i32, i32
  }
  func.func @transform_10(%arg0: i32) -> (i32, i32) {
    %c0_i32 = arith.constant 0 : i32
    %c0_i32_0 = arith.constant 0 : i32
    return %arg0, %c0_i32 : i32, i32
  }
  func.func @transform_11(%arg0: i32) -> (i32, i32) {
    %c0_i32 = arith.constant 0 : i32
    %c0_i32_0 = arith.constant 0 : i32
    return %arg0, %c0_i32 : i32, i32
  }
}

</mosaic_0001>

<bundles_post_ra>
// kernel: _vae_forward.1
= control target key start
LH: loop header
LB: loop body
LE: loop exit
PB: predicated region body
PF: predicated region fallthrough
CT: control target
= control target key end

     0   :  { %vm1265_vm0 = vcmask 130048   ;;  %s7379_s0 = inlined_call_operand.vmem [shape: bf16[8,784], index: 0, kind: input, shape index: {}]   ;;  %s7380_s1 = inlined_call_operand.vmem [shape: f32[8,128], index: 1, kind: input, shape index: {}]   ;;  %s7381_s2 = inlined_call_operand.vmem [shape: bf16[784,512], index: 2, kind: input, shape index: {}]   ;;  %s7382_s3 = inlined_call_operand.vmem [shape: f32[1,512], index: 3, kind: input, shape index: {}]   ;;  %s7383_s4 = inlined_call_operand.vmem [shape: bf16[512,256], index: 4, kind: input, shape index: {}]   ;;  %s7384_s5 = inlined_call_operand.vmem [shape: f32[1,256], index: 5, kind: input, shape index: {}]   ;;  %s7385_s6 = inlined_call_operand.vmem [shape: bf16[128,512], index: 6, kind: input, shape index: {}]   ;;  %s7386_s7 = inlined_call_operand.vmem [shape: f32[1,512], index: 7, kind: input, shape index: {}]   ;;  %s7387_s8 = inlined_call_operand.vmem [shape: bf16[512,784], index: 8, kind: input, shape index: {}]   ;;  %s7388_s9 = inlined_call_operand.vmem [shape: f32[1,784], index: 9, kind: input, shape index: {}]   ;;  %s7389_s10 = inlined_call_operand.hbm [shape: f32[8,784], index: 10, kind: output, shape index: {0}]   ;;  %s7390_s11 = inlined_call_operand.vmem [shape: f32[8,256], index: 11, kind: output, shape index: {1}]  }
   0x1   :  { %v4811_v0 = vld [vmem:[%s7381_s2 + $0xe4] ss:$16 sps:$4 sm:$0xff]   ;;  %v4815_v2 = vld [vmem:[%s7381_s2 + $0xe0] ss:$16 sps:$4 sm:$0xff]   ;;  %v40_v48 = vld [vmem:[%s7379_s0 + $0x8] sm:$0xff] }
   0x2   :  { %v4813_v1 = vld [vmem:[%s7381_s2 + $0x2e4] ss:$16 sps:$4 sm:$0xff]   ;;  %1269 = vmatprep.subr.bf16.mxu0 %v4811_v0  ;;  %v4816_v3 = vld [vmem:[%s7381_s2 + $0x2e0] ss:$16 sps:$4 sm:$0xff]   ;;  %v5843_v51 = vcombine.high %v40_v48, %v40_v48 }
   0x3   :  { %1310 = vmatprep.subr.bf16.mxu1 %v4813_v1  ;;  %v4817_v4 = vld [vmem:[%s7381_s2 + $0xc4] ss:$16 sps:$4 sm:$0xff]   ;;  %1270 = vmatpush1.bf16.msra.mxu0 %v4815_v2  ;;  %v4821_v6 = vld [vmem:[%s7381_s2 + $0xc0] ss:$16 sps:$4 sm:$0xff]  }
   0x4   :  { %1311 = vmatpush1.bf16.msra.mxu1 %v4816_v3  ;;  %v4819_v5 = vld [vmem:[%s7381_s2 + $0x2c4] ss:$16 sps:$4 sm:$0xff]   ;;  %1271 = vmatprep.subr.bf16.mxu0 %v4817_v4  ;;  %v4822_v7 = vld [vmem:[%s7381_s2 + $0x2c0] ss:$16 sps:$4 sm:$0xff]  }
   0x5   :  { %1312 = vmatprep.subr.bf16.mxu1 %v4819_v5  ;;  %v4823_v8 = vld [vmem:[%s7381_s2 + $0xa4] ss:$16 sps:$4 sm:$0xff]   ;;  %v4827_v10 = vld [vmem:[%s7381_s2 + $0xa0] ss:$16 sps:$4 sm:$0xff]   ;;  %1342 = vmatprep.mubr.bf16.mxu1 %v5843_v51 }
   0x6   :  { %v4825_v9 = vld [vmem:[%s7381_s2 + $0x2a4] ss:$16 sps:$4 sm:$0xff]   ;;  %v4828_v11 = vld [vmem:[%s7381_s2 + $0x2a0] ss:$16 sps:$4 sm:$0xff]  }
   0x7   :  { %1272 = vmatpush1.bf16.msra.mxu0 %v4821_v6  ;;  %v4829_v12 = vld [vmem:[%s7381_s2 + $0x84] ss:$16 sps:$4 sm:$0xff]   ;;  %v4833_v14 = vld [vmem:[%s7381_s2 + $0x80] ss:$16 sps:$4 sm:$0xff]  }
   0x8   :  { %1313 = vmatpush1.bf16.msra.mxu1 %v4822_v7  ;;  %1273 = vmatprep.subr.bf16.mxu0 %v4823_v8  ;;  %v4831_v13 = vld [vmem:[%s7381_s2 + $0x284] ss:$16 sps:$4 sm:$0xff]   ;;  %v4834_v15 = vld [vmem:[%s7381_s2 + $0x280] ss:$16 sps:$4 sm:$0xff]   ;;  %v5903_v7 = vcombine.low %v40_v48, %v40_v48  ;;  %v4971_v48 = vld [vmem:[%s7381_s2 + $0x1ec] ss:$16 sps:$4 sm:$0xff]  }
   0x9   :  { %1314 = vmatprep.subr.bf16.mxu1 %v4825_v9  ;;  %v4835_v16 = vld [vmem:[%s7381_s2 + $0x64] ss:$16 sps:$4 sm:$0xff]   ;;  %v4839_v18 = vld [vmem:[%s7381_s2 + $0x60] ss:$16 sps:$4 sm:$0xff]  }
   0xa   :  { %v4837_v17 = vld [vmem:[%s7381_s2 + $0x264] ss:$16 sps:$4 sm:$0xff]   ;;  %v4840_v19 = vld [vmem:[%s7381_s2 + $0x260] ss:$16 sps:$4 sm:$0xff]  }
   0xb   :  { %1274 = vmatpush1.bf16.msra.mxu0 %v4827_v10  ;;  %v4841_v20 = vld [vmem:[%s7381_s2 + $0x44] ss:$16 sps:$4 sm:$0xff]   ;;  %v4845_v22 = vld [vmem:[%s7381_s2 + $0x40] ss:$16 sps:$4 sm:$0xff]  }
   0xc   :  { %1315 = vmatpush1.bf16.msra.mxu1 %v4828_v11  ;;  %1275 = vmatprep.subr.bf16.mxu0 %v4829_v12  ;;  %v4843_v21 = vld [vmem:[%s7381_s2 + $0x244] ss:$16 sps:$4 sm:$0xff]   ;;  %v4846_v23 = vld [vmem:[%s7381_s2 + $0x240] ss:$16 sps:$4 sm:$0xff]   ;;  %v4922_v11 = vld [vmem:[%s7381_s2 + $0xec] ss:$16 sps:$4 sm:$0xff]  }
   0xd   :  { %1316 = vmatprep.subr.bf16.mxu1 %v4831_v13  ;;  %v4847_v24 = vld [vmem:[%s7381_s2 + $0x24] ss:$16 sps:$4 sm:$0xff]   ;;  %v4851_v26 = vld [vmem:[%s7381_s2 + $0x20] ss:$16 sps:$4 sm:$0xff]   ;;  %v5629_v13 = vmov 0  }
   0xe   :  { %v4849_v25 = vld [vmem:[%s7381_s2 + $0x224] ss:$16 sps:$4 sm:$0xff]   ;;  %v4852_v27 = vld [vmem:[%s7381_s2 + $0x220] ss:$16 sps:$4 sm:$0xff]  }
   0xf   :  { %1276 = vmatpush1.bf16.msra.mxu0 %v4833_v14  ;;  %v4853_v28 = vld [vmem:[%s7381_s2 + $0x4] ss:$16 sps:$4 sm:$0xff]   ;;  %v4857_v30 = vld [vmem:[%s7381_s2] ss:$16 sps:$4 sm:$0xff]  }
  0x10   :  { %1317 = vmatpush1.bf16.msra.mxu1 %v4834_v15  ;;  %1277 = vmatprep.subr.bf16.mxu0 %v4835_v16  ;;  %v4855_v29 = vld [vmem:[%s7381_s2 + $0x204] ss:$16 sps:$4 sm:$0xff]   ;;  %v4858_v31 = vld [vmem:[%s7381_s2 + $0x200] ss:$16 sps:$4 sm:$0xff]   ;;  %v4920_v15 = vld [vmem:[%s7381_s2 + $0xe8] ss:$16 sps:$4 sm:$0xff]  }
  0x11   :  { %1318 = vmatprep.subr.bf16.mxu1 %v4837_v17  ;;  %v4859_v32 = vld [vmem:[%s7381_s2 + $0x1e4] ss:$16 sps:$4 sm:$0xff]   ;;  %v4863_v34 = vld [vmem:[%s7381_s2 + $0x1e0] ss:$16 sps:$4 sm:$0xff]   ;;  %v4926_v17 = vld [vmem:[%s7379_s0 + $0x18] ss:$0 sps:$4 sm:$0xff]  }
  0x12   :  { %v4861_v33 = vld [vmem:[%s7381_s2 + $0x3e4] ss:$16 sps:$4 sm:$0xff]   ;;  %v4864_v35 = vld [vmem:[%s7381_s2 + $0x3e0] ss:$16 sps:$4 sm:$0xff]  }
  0x13   :  { %1278 = vmatpush1.bf16.msra.mxu0 %v4839_v18  ;;  %v4865_v36 = vld [vmem:[%s7381_s2 + $0x1c4] ss:$16 sps:$4 sm:$0xff]   ;;  %v4869_v38 = vld [vmem:[%s7381_s2 + $0x1c0] ss:$16 sps:$4 sm:$0xff]   ;;  %v4929_v18 = vld [vmem:[%s7381_s2 + $0xcc] ss:$16 sps:$4 sm:$0xff]  }
  0x14   :  { %1319 = vmatpush1.bf16.msra.mxu1 %v4840_v19  ;;  %1279 = vmatprep.subr.bf16.mxu0 %v4841_v20  ;;  %v4867_v37 = vld [vmem:[%s7381_s2 + $0x3c4] ss:$16 sps:$4 sm:$0xff]   ;;  %v4870_v39 = vld [vmem:[%s7381_s2 + $0x3c0] ss:$16 sps:$4 sm:$0xff]   ;;  %v4927_v20 = vld [vmem:[%s7381_s2 + $0xc8] ss:$16 sps:$4 sm:$0xff]  }
  0x15   :  { %1320 = vmatprep.subr.bf16.mxu1 %v4843_v21  ;;  %v4871_v40 = vld [vmem:[%s7381_s2 + $0x1a4] ss:$16 sps:$4 sm:$0xff]   ;;  %v4875_v42 = vld [vmem:[%s7381_s2 + $0x1a0] ss:$16 sps:$4 sm:$0xff]  }
  0x16   :  { %v4873_v41 = vld [vmem:[%s7381_s2 + $0x3a4] ss:$16 sps:$4 sm:$0xff]   ;;  %v4876_v43 = vld [vmem:[%s7381_s2 + $0x3a0] ss:$16 sps:$4 sm:$0xff]  }
  0x17   :  { %1280 = vmatpush1.bf16.msra.mxu0 %v4845_v22  ;;  %v4877_v44 = vld [vmem:[%s7381_s2 + $0x184] ss:$16 sps:$4 sm:$0xff]   ;;  %v4881_v49 = vld [vmem:[%s7381_s2 + $0x180] ss:$16 sps:$4 sm:$0xff]   ;;  %v4935_v22 = vld [vmem:[%s7381_s2 + $0xac] ss:$16 sps:$4 sm:$0xff]  }
  0x18   :  { %1321 = vmatpush1.bf16.msra.mxu1 %v4846_v23  ;;  %1281 = vmatprep.subr.bf16.mxu0 %v4847_v24  ;;  %v4879_v45 = vld [vmem:[%s7381_s2 + $0x384] ss:$16 sps:$4 sm:$0xff]   ;;  %v4882_v50 = vld [vmem:[%s7381_s2 + $0x380] ss:$16 sps:$4 sm:$0xff]   ;;  %v4933_v24 = vld [vmem:[%s7381_s2 + $0xa8] ss:$16 sps:$4 sm:$0xff]  }
  0x19   :  { %1322 = vmatprep.subr.bf16.mxu1 %v4849_v25  ;;  %v39_v46 = vld [vmem:[%s7379_s0] sm:$0xff] }
  0x1a   :  { %v5832_v47 = vcombine.high %v39_v46, %v39_v46  ;;  %v4883_v52 = vld [vmem:[%s7381_s2 + $0x164] ss:$16 sps:$4 sm:$0xff]   ;;  %v4887_v54 = vld [vmem:[%s7381_s2 + $0x160] ss:$16 sps:$4 sm:$0xff]   ;;  %v5901_v6 = vcombine.low %v39_v46, %v39_v46  ;;  %v4963_v46 = vld [vmem:[%s7381_s2 + $0x8] ss:$16 sps:$4 sm:$0xff]  }
  0x1b   :  { %1282 = vmatpush1.bf16.msra.mxu0 %v4851_v26  ;;  %v4885_v53 = vld [vmem:[%s7381_s2 + $0x364] ss:$16 sps:$4 sm:$0xff]   ;;  %v4888_v55 = vld [vmem:[%s7381_s2 + $0x360] ss:$16 sps:$4 sm:$0xff]   ;;  %v4941_v26 = vld [vmem:[%s7381_s2 + $0x8c] ss:$16 sps:$4 sm:$0xff]  }
  0x1c   :  { %1323 = vmatpush1.bf16.msra.mxu1 %v4852_v27  ;;  %1283 = vmatprep.subr.bf16.mxu0 %v4853_v28  ;;  %v4889_v56 = vld [vmem:[%s7381_s2 + $0x144] ss:$16 sps:$4 sm:$0xff]   ;;  %v4893_v58 = vld [vmem:[%s7381_s2 + $0x140] ss:$16 sps:$4 sm:$0xff]   ;;  %v4939_v28 = vld [vmem:[%s7381_s2 + $0x88] ss:$16 sps:$4 sm:$0xff]  }
  0x1d   :  { %1324 = vmatprep.subr.bf16.mxu1 %v4855_v29  ;;  %1301 = vmatprep.mubr.bf16.mxu0 %v5832_v47  ;;  %v4891_v57 = vld [vmem:[%s7381_s2 + $0x344] ss:$16 sps:$4 sm:$0xff]   ;;  %v4894_v59 = vld [vmem:[%s7381_s2 + $0x340] ss:$16 sps:$4 sm:$0xff]  }
  0x1e   :  { %v4895_v60 = vld [vmem:[%s7381_s2 + $0x124] ss:$16 sps:$4 sm:$0xff]   ;;  %v4899_v62 = vld [vmem:[%s7381_s2 + $0x120] ss:$16 sps:$4 sm:$0xff]  }
  0x1f   :  { %1284 = vmatpush1.bf16.msra.mxu0 %v4857_v30  ;;  %v4897_v61 = vld [vmem:[%s7381_s2 + $0x324] ss:$16 sps:$4 sm:$0xff]   ;;  %v4900_v63 = vld [vmem:[%s7381_s2 + $0x320] ss:$16 sps:$4 sm:$0xff]   ;;  %v4947_v30 = vld [vmem:[%s7381_s2 + $0x6c] ss:$16 sps:$4 sm:$0xff]  }
  0x20   :  { %1325 = vmatpush1.bf16.msra.mxu1 %v4858_v31  ;;  %1285 = vmatprep.subr.bf16.mxu0 %v4859_v32  ;;  %v4901_v0 = vld [vmem:[%s7381_s2 + $0x104] ss:$16 sps:$4 sm:$0xff]   ;;  %v4905_v2 = vld [vmem:[%s7381_s2 + $0x100] ss:$16 sps:$4 sm:$0xff]  }
  0x21   :  { %1326 = vmatprep.subr.bf16.mxu1 %v4861_v33  ;;  %v4903_v1 = vld [vmem:[%s7381_s2 + $0x304] ss:$16 sps:$4 sm:$0xff]   ;;  %v4906_v3 = vld [vmem:[%s7381_s2 + $0x300] ss:$16 sps:$4 sm:$0xff]  }
  0x22   :  { %v4913_v4 = vld [vmem:[%s7381_s2 + $0x4e4] ss:$16 sps:$4 sm:$0xff]   ;;  %v4911_v8 = vld [vmem:[%s7381_s2 + $0x4e0] ss:$16 sps:$4 sm:$0xff]  }
  0x23   :  { %1286 = vmatpush2.bf16.msra.mxu0 %v4863_v34  ;;  %v4916_v5 = vld [vmem:[%s7381_s2 + $0x604] ss:$16 sps:$4 sm:$0xff]   ;;  %v4914_v9 = vld [vmem:[%s7381_s2 + $0x600] ss:$16 sps:$4 sm:$0xff]   ;;  %v4945_v34 = vld [vmem:[%s7381_s2 + $0x68] ss:$16 sps:$4 sm:$0xff]  }
  0x24   :  { %1327 = vmatpush2.bf16.msra.mxu1 %v4864_v35  ;;  %1287 = vmatprep.subr.bf16.mxu0 %v4865_v36  ;;  %v4919_v10 = vld [vmem:[%s7381_s2 + $0x4c4] ss:$16 sps:$4 sm:$0xff]   ;;  %v4917_v12 = vld [vmem:[%s7381_s2 + $0x4c0] ss:$16 sps:$4 sm:$0xff]   ;;  %v4953_v36 = vld [vmem:[%s7381_s2 + $0x4c] ss:$16 sps:$4 sm:$0xff]  }
  0x25   :  { %1328 = vmatprep.subr.bf16.mxu1 %v4867_v37  ;;  %v4925_v14 = vld [vmem:[%s7381_s2 + $0x4a4] ss:$16 sps:$4 sm:$0xff]   ;;  %v4923_v16 = vld [vmem:[%s7381_s2 + $0x4a0] ss:$16 sps:$4 sm:$0xff]  }
  0x26   :  { %v4932_v19 = vld [vmem:[%s7381_s2 + $0x484] ss:$16 sps:$4 sm:$0xff]   ;;  %v4930_v21 = vld [vmem:[%s7381_s2 + $0x480] ss:$16 sps:$4 sm:$0xff]  }
  0x27   :  { %1288 = vmatpush2.bf16.msra.mxu0 %v4869_v38  ;;  %v4938_v23 = vld [vmem:[%s7381_s2 + $0x464] ss:$16 sps:$4 sm:$0xff]   ;;  %v4936_v25 = vld [vmem:[%s7381_s2 + $0x460] ss:$16 sps:$4 sm:$0xff]   ;;  %v4951_v38 = vld [vmem:[%s7381_s2 + $0x48] ss:$16 sps:$4 sm:$0xff]  }
  0x28   :  { %1329 = vmatpush2.bf16.msra.mxu1 %v4870_v39  ;;  %1289 = vmatprep.subr.bf16.mxu0 %v4871_v40  ;;  %v4944_v27 = vld [vmem:[%s7381_s2 + $0x444] ss:$16 sps:$4 sm:$0xff]   ;;  %v4942_v29 = vld [vmem:[%s7381_s2 + $0x440] ss:$16 sps:$4 sm:$0xff]   ;;  %v4959_v40 = vld [vmem:[%s7381_s2 + $0x2c] ss:$16 sps:$4 sm:$0xff]  }
  0x29   :  { %1330 = vmatprep.subr.bf16.mxu1 %v4873_v41  ;;  %v4950_v31 = vld [vmem:[%s7381_s2 + $0x424] ss:$16 sps:$4 sm:$0xff]   ;;  %v4948_v35 = vld [vmem:[%s7381_s2 + $0x420] ss:$16 sps:$4 sm:$0xff]  }
  0x2a   :  { %v5982_v32 = vld [vmem:[%s7379_s0 + $0x10] sm:$0xff] }
  0x2b   :  { %1290 = vmatpush2.bf16.msra.mxu0 %v4875_v42  ;;  %v5986_v33 = vcombine.high %v5982_v32, %v5982_v32  ;;  %v4956_v37 = vld [vmem:[%s7381_s2 + $0x404] ss:$16 sps:$4 sm:$0xff]   ;;  %v4954_v39 = vld [vmem:[%s7381_s2 + $0x400] ss:$16 sps:$4 sm:$0xff]   ;;  %v4957_v42 = vld [vmem:[%s7381_s2 + $0x28] ss:$16 sps:$4 sm:$0xff]  }
  0x2c   :  { %1331 = vmatpush2.bf16.msra.mxu1 %v4876_v43  ;;  %1291 = vmatprep.subr.bf16.mxu0 %v4877_v44  ;;  %v4962_v41 = vld [vmem:[%s7381_s2 + $0x5e4] ss:$16 sps:$4 sm:$0xff]   ;;  %v4960_v43 = vld [vmem:[%s7381_s2 + $0x5e0] ss:$16 sps:$4 sm:$0xff]   ;;  %v4965_v44 = vld [vmem:[%s7381_s2 + $0xc] ss:$16 sps:$4 sm:$0xff]  }
  0x2d   :  { %1332 = vmatprep.subr.bf16.mxu1 %v4879_v45  ;;  %v4968_v45 = vld [vmem:[%s7381_s2 + $0x5c4] ss:$16 sps:$4 sm:$0xff]  }
  0x2f   :  { %1292 = vmatpush2.bf16.msra.mxu0 %v4881_v49  ;;  %v4974_v49 = vld [vmem:[%s7381_s2 + $0x5a4] ss:$16 sps:$4 sm:$0xff]  }
  0x30   :  { %1333 = vmatpush2.bf16.msra.mxu1 %v4882_v50  ;;  %1293 = vmatprep.subr.bf16.mxu0 %v4883_v52  ;;  %v4969_v50 = vld [vmem:[%s7381_s2 + $0x1e8] ss:$16 sps:$4 sm:$0xff]   ;;  %v4972_v52 = vld [vmem:[%s7381_s2 + $0x5a0] ss:$16 sps:$4 sm:$0xff]  }
  0x31   :  { %1334 = vmatprep.subr.bf16.mxu1 %v4885_v53  ;;  %v4977_v53 = vld [vmem:[%s7381_s2 + $0x1cc] ss:$16 sps:$4 sm:$0xff]  }
  0x33   :  { %1294 = vmatpush2.bf16.msra.mxu0 %v4887_v54  ;;  %v4980_v54 = vld [vmem:[%s7381_s2 + $0x584] ss:$16 sps:$4 sm:$0xff]  }
  0x34   :  { %1335 = vmatpush2.bf16.msra.mxu1 %v4888_v55  ;;  %1295 = vmatprep.subr.bf16.mxu0 %v4889_v56  ;;  %v4975_v55 = vld [vmem:[%s7381_s2 + $0x1c8] ss:$16 sps:$4 sm:$0xff]   ;;  %v4978_v56 = vld [vmem:[%s7381_s2 + $0x580] ss:$16 sps:$4 sm:$0xff]  }
  0x35   :  { %1336 = vmatprep.subr.bf16.mxu1 %v4891_v57  ;;  %v4983_v57 = vld [vmem:[%s7381_s2 + $0x1ac] ss:$16 sps:$4 sm:$0xff]  }
  0x37   :  { %1296 = vmatpush2.bf16.msra.mxu0 %v4893_v58  ;;  %v4986_v58 = vld [vmem:[%s7381_s2 + $0x564] ss:$16 sps:$4 sm:$0xff]  }
  0x38   :  { %1337 = vmatpush2.bf16.msra.mxu1 %v4894_v59  ;;  %1297 = vmatprep.subr.bf16.mxu0 %v4895_v60  ;;  %v4981_v59 = vld [vmem:[%s7381_s2 + $0x1a8] ss:$16 sps:$4 sm:$0xff]   ;;  %v4984_v60 = vld [vmem:[%s7381_s2 + $0x560] ss:$16 sps:$4 sm:$0xff]  }
  0x39   :  { %1338 = vmatprep.subr.bf16.mxu1 %v4897_v61  ;;  %v4989_v61 = vld [vmem:[%s7381_s2 + $0x18c] ss:$16 sps:$4 sm:$0xff]  }
  0x3b   :  { %1298 = vmatpush2.bf16.msra.mxu0 %v4899_v62  ;;  %v4992_v62 = vld [vmem:[%s7381_s2 + $0x544] ss:$16 sps:$4 sm:$0xff]  }
  0x3c   :  { %1339 = vmatpush2.bf16.msra.mxu1 %v4900_v63  ;;  %1299 = vmatprep.subr.bf16.mxu0 %v4901_v0  ;;  %v4987_v63 = vld [vmem:[%s7381_s2 + $0x188] ss:$16 sps:$4 sm:$0xff]   ;;  %v4990_v0 = vld [vmem:[%s7381_s2 + $0x540] ss:$16 sps:$4 sm:$0xff]  }
  0x3d   :  { %1340 = vmatprep.subr.bf16.mxu1 %v4903_v1  ;;  %v4995_v1 = vld [vmem:[%s7381_s2 + $0x16c] ss:$16 sps:$4 sm:$0xff]  }
  0x3f   :  { %1300 = vmatpush2.bf16.msra.mxu0 %v4905_v2  ;;  %v4998_v2 = vld [vmem:[%s7381_s2 + $0x524] ss:$16 sps:$4 sm:$0xff]  }
  0x40   :  { %1341 = vmatpush2.bf16.msra.mxu1 %v4906_v3  ;;  %1351 = vmatprep.subr.bf16.mxu0 %v4913_v4  ;;  %v4993_v3 = vld [vmem:[%s7381_s2 + $0x168] ss:$16 sps:$4 sm:$0xff]   ;;  %v4996_v4 = vld [vmem:[%s7381_s2 + $0x520] ss:$16 sps:$4 sm:$0xff]  }
  0x41   :  { %1406 = vmatprep.subr.bf16.mxu1 %v4916_v5  ;;  %v5001_v5 = vld [vmem:[%s7381_s2 + $0x14c] ss:$16 sps:$4 sm:$0xff]  }
  0x42   :  { %1302 = vmatmul.mubr.bf16.vlgmr.msra.gmra.mxu0 %v5901_v6 }
  0x43   :  { %1343 = vmatmul.mubr.bf16.vlgmr.msra.gmra.mxu1 %v5903_v7  ;;  %1352 = vmatpush1.bf16.msra.mxu0 %v4911_v8  ;;  %v5004_v8 = vld [vmem:[%s7381_s2 + $0x504] ss:$16 sps:$4 sm:$0xff]  }
  0x44   :  { %1407 = vmatpush1.bf16.msra.mxu1 %v4914_v9  ;;  %1353 = vmatprep.subr.bf16.mxu0 %v4919_v10  ;;  %v4999_v9 = vld [vmem:[%s7381_s2 + $0x148] ss:$16 sps:$4 sm:$0xff]   ;;  %v5002_v10 = vld [vmem:[%s7381_s2 + $0x500] ss:$16 sps:$4 sm:$0xff]  }
  0x45   :  { %1424 = vmatprep.mubr.bf16.mxu1 %v5629_v13  ;;  %1433 = vmatprep.subr.bf16.mxu1 %v4922_v11  ;;  %v5009_v11 = vld [vmem:[%s7381_s2 + $0x12c] ss:$16 sps:$4 sm:$0xff]  }
  0x46   :  { %1383 = vmatprep.mubr.bf16.mxu0 %v5986_v33 }
  0x47   :  { %1354 = vmatpush1.bf16.msra.mxu0 %v4917_v12  ;;  %v5012_v12 = vld [vmem:[%s7381_s2 + $0x2ec] ss:$16 sps:$4 sm:$0xff]  }
  0x48   :  { %1355 = vmatprep.subr.bf16.mxu0 %v4925_v14  ;;  %v6111_v14 = vcombine.low %v5982_v32, %v5982_v32  ;;  %v5042_v32 = vld [vmem:[%s7381_s2 + $0x24c] ss:$16 sps:$4 sm:$0xff]  }
  0x4b   :  { %4436 = vmatmul.mubr.msk.bf16.vlgmr.msra.gmra.mxu1 %vm1265_vm0, %v4926_v17  ;;  %1356 = vmatpush1.bf16.msra.mxu0 %v4923_v16  ;;  %v5010_v16 = vld [vmem:[%s7381_s2 + $0x2e8] ss:$16 sps:$4 sm:$0xff]   ;;  %v5015_v17 = vld [vmem:[%s7381_s2 + $0x10c] ss:$16 sps:$4 sm:$0xff]  }
  0x4c   :  { %1434 = vmatpush1.bf16.msra.mxu1 %v4920_v15  ;;  %1357 = vmatprep.subr.bf16.mxu0 %v4932_v19  ;;  %v5007_v15 = vld [vmem:[%s7381_s2 + $0x128] ss:$16 sps:$4 sm:$0xff]  }
  0x4d   :  { %1435 = vmatprep.subr.bf16.mxu1 %v4929_v18  ;;  %1465 = vmatprep.mubr.bf16.mxu1 %v5832_v47  ;;  %v4966_v47 = vld [vmem:[%s7381_s2 + $0x5c0] ss:$16 sps:$4 sm:$0xff]   ;;  %v5018_v18 = vld [vmem:[%s7381_s2 + $0x2cc] ss:$16 sps:$4 sm:$0xff]   ;;  %v5013_v19 = vld [vmem:[%s7381_s2 + $0x108] ss:$16 sps:$4 sm:$0xff]  }
  0x4f   :  { %1358 = vmatpush1.bf16.msra.mxu0 %v4930_v21  ;;  %v5021_v21 = vld [vmem:[%s7381_s2 + $0x4ec] ss:$16 sps:$4 sm:$0xff]  }
  0x50   :  { %1436 = vmatpush1.bf16.msra.mxu1 %v4927_v20  ;;  %1359 = vmatprep.subr.bf16.mxu0 %v4938_v23  ;;  %v5016_v20 = vld [vmem:[%s7381_s2 + $0x2c8] ss:$16 sps:$4 sm:$0xff]  }
  0x51   :  { %1437 = vmatprep.subr.bf16.mxu1 %v4935_v22  ;;  %v5024_v22 = vld [vmem:[%s7381_s2 + $0x2ac] ss:$16 sps:$4 sm:$0xff]   ;;  %v5019_v23 = vld [vmem:[%s7381_s2 + $0x4e8] ss:$16 sps:$4 sm:$0xff]  }
  0x53   :  { %1360 = vmatpush1.bf16.msra.mxu0 %v4936_v25  ;;  %v5027_v25 = vld [vmem:[%s7381_s2 + $0x4cc] ss:$16 sps:$4 sm:$0xff]  }
  0x54   :  { %1438 = vmatpush1.bf16.msra.mxu1 %v4933_v24  ;;  %1361 = vmatprep.subr.bf16.mxu0 %v4944_v27  ;;  %v5022_v24 = vld [vmem:[%s7381_s2 + $0x2a8] ss:$16 sps:$4 sm:$0xff]  }
  0x55   :  { %1439 = vmatprep.subr.bf16.mxu1 %v4941_v26  ;;  %v5030_v26 = vld [vmem:[%s7381_s2 + $0x28c] ss:$16 sps:$4 sm:$0xff]   ;;  %v5025_v27 = vld [vmem:[%s7381_s2 + $0x4c8] ss:$16 sps:$4 sm:$0xff]  }
  0x57   :  { %1362 = vmatpush1.bf16.msra.mxu0 %v4942_v29  ;;  %v5036_v29 = vld [vmem:[%s7381_s2 + $0x26c] ss:$16 sps:$4 sm:$0xff]  }
  0x58   :  { %1440 = vmatpush1.bf16.msra.mxu1 %v4939_v28  ;;  %1363 = vmatprep.subr.bf16.mxu0 %v4950_v31  ;;  %v5033_v28 = vld [vmem:[%s7381_s2 + $0x4ac] ss:$16 sps:$4 sm:$0xff]  }
  0x59   :  { %1441 = vmatprep.subr.bf16.mxu1 %v4947_v30  ;;  %v5031_v30 = vld [vmem:[%s7381_s2 + $0x4a8] ss:$16 sps:$4 sm:$0xff]   ;;  %v5039_v31 = vld [vmem:[%s7381_s2 + $0x48c] ss:$16 sps:$4 sm:$0xff]  }
  0x5b   :  { %1364 = vmatpush1.bf16.msra.mxu0 %v4948_v35  ;;  %v5045_v35 = vld [vmem:[%s7381_s2 + $0x46c] ss:$16 sps:$4 sm:$0xff]  }
  0x5c   :  { %1442 = vmatpush1.bf16.msra.mxu1 %v4945_v34  ;;  %1365 = vmatprep.subr.bf16.mxu0 %v4956_v37  ;;  %v5040_v34 = vld [vmem:[%s7381_s2 + $0x248] ss:$16 sps:$4 sm:$0xff]  }
  0x5d   :  { %1443 = vmatprep.subr.bf16.mxu1 %v4953_v36  ;;  %v5048_v36 = vld [vmem:[%s7381_s2 + $0x22c] ss:$16 sps:$4 sm:$0xff]   ;;  %v5043_v37 = vld [vmem:[%s7381_s2 + $0x468] ss:$16 sps:$4 sm:$0xff]  }
  0x5f   :  { %1366 = vmatpush1.bf16.msra.mxu0 %v4954_v39  ;;  %v5051_v39 = vld [vmem:[%s7381_s2 + $0x44c] ss:$16 sps:$4 sm:$0xff]  }
  0x60   :  { %1444 = vmatpush1.bf16.msra.mxu1 %v4951_v38  ;;  %1367 = vmatprep.subr.bf16.mxu0 %v4962_v41  ;;  %v5046_v38 = vld [vmem:[%s7381_s2 + $0x228] ss:$16 sps:$4 sm:$0xff]  }
  0x61   :  { %1445 = vmatprep.subr.bf16.mxu1 %v4959_v40  ;;  %v5054_v40 = vld [vmem:[%s7381_s2 + $0x20c] ss:$16 sps:$4 sm:$0xff]   ;;  %v5049_v41 = vld [vmem:[%s7381_s2 + $0x448] ss:$16 sps:$4 sm:$0xff]  }
  0x63   :  { %1368 = vmatpush2.bf16.msra.mxu0 %v4960_v43  ;;  %v5057_v43 = vld [vmem:[%s7381_s2 + $0x42c] ss:$16 sps:$4 sm:$0xff]  }
  0x64   :  { %1446 = vmatpush1.bf16.msra.mxu1 %v4957_v42  ;;  %1369 = vmatprep.subr.bf16.mxu0 %v4968_v45  ;;  %v5052_v42 = vld [vmem:[%s7381_s2 + $0x208] ss:$16 sps:$4 sm:$0xff]  }
  0x65   :  { %1447 = vmatprep.subr.bf16.mxu1 %v4965_v44  ;;  %v5060_v44 = vld [vmem:[%s7381_s2 + $0x3ec] ss:$16 sps:$4 sm:$0xff]   ;;  %v5055_v45 = vld [vmem:[%s7381_s2 + $0x428] ss:$16 sps:$4 sm:$0xff]  }
  0x67   :  { %1370 = vmatpush2.bf16.msra.mxu0 %v4966_v47  ;;  %v5063_v47 = vld [vmem:[%s7381_s2 + $0x40c] ss:$16 sps:$4 sm:$0xff]  }
  0x68   :  { %1448 = vmatpush1.bf16.msra.mxu1 %v4963_v46  ;;  %1371 = vmatprep.subr.bf16.mxu0 %v4974_v49  ;;  %v5058_v46 = vld [vmem:[%s7381_s2 + $0x3e8] ss:$16 sps:$4 sm:$0xff]  }
  0x69   :  { %1449 = vmatprep.subr.bf16.mxu1 %v4971_v48  ;;  %v5066_v48 = vld [vmem:[%s7381_s2 + $0x3cc] ss:$16 sps:$4 sm:$0xff]   ;;  %v5061_v49 = vld [vmem:[%s7381_s2 + $0x408] ss:$16 sps:$4 sm:$0xff]  }
  0x6b   :  { %1372 = vmatpush2.bf16.msra.mxu0 %v4972_v52  ;;  %v5069_v52 = vld [vmem:[%s7381_s2 + $0x5ec] ss:$16 sps:$4 sm:$0xff]  }
  0x6c   :  { %1450 = vmatpush2.bf16.msra.mxu1 %v4969_v50  ;;  %1373 = vmatprep.subr.bf16.mxu0 %v4980_v54  ;;  %v5064_v50 = vld [vmem:[%s7381_s2 + $0x3c8] ss:$16 sps:$4 sm:$0xff]  }
  0x6d   :  { %1451 = vmatprep.subr.bf16.mxu1 %v4977_v53  ;;  %v5072_v53 = vld [vmem:[%s7381_s2 + $0x3ac] ss:$16 sps:$4 sm:$0xff]   ;;  %v5067_v54 = vld [vmem:[%s7381_s2 + $0x5e8] ss:$16 sps:$4 sm:$0xff]  }
  0x6f   :  { %1374 = vmatpush2.bf16.msra.mxu0 %v4978_v56  ;;  %v5075_v56 = vld [vmem:[%s7381_s2 + $0x5cc] ss:$16 sps:$4 sm:$0xff]  }
  0x70   :  { %1452 = vmatpush2.bf16.msra.mxu1 %v4975_v55  ;;  %1375 = vmatprep.subr.bf16.mxu0 %v4986_v58  ;;  %v5070_v55 = vld [vmem:[%s7381_s2 + $0x3a8] ss:$16 sps:$4 sm:$0xff]  }
  0x71   :  { %1453 = vmatprep.subr.bf16.mxu1 %v4983_v57  ;;  %v5078_v57 = vld [vmem:[%s7381_s2 + $0x38c] ss:$16 sps:$4 sm:$0xff]   ;;  %v5073_v58 = vld [vmem:[%s7381_s2 + $0x5c8] ss:$16 sps:$4 sm:$0xff]  }
  0x73   :  { %1376 = vmatpush2.bf16.msra.mxu0 %v4984_v60  ;;  %v5081_v60 = vld [vmem:[%s7381_s2 + $0x5ac] ss:$16 sps:$4 sm:$0xff]  }
  0x74   :  { %1454 = vmatpush2.bf16.msra.mxu1 %v4981_v59  ;;  %1377 = vmatprep.subr.bf16.mxu0 %v4992_v62  ;;  %v5076_v59 = vld [vmem:[%s7381_s2 + $0x388] ss:$16 sps:$4 sm:$0xff]  }
  0x75   :  { %1455 = vmatprep.subr.bf16.mxu1 %v4989_v61  ;;  %v5084_v61 = vld [vmem:[%s7381_s2 + $0x36c] ss:$16 sps:$4 sm:$0xff]   ;;  %v5079_v62 = vld [vmem:[%s7381_s2 + $0x5a8] ss:$16 sps:$4 sm:$0xff]  }
  0x77   :  { %1378 = vmatpush2.bf16.msra.mxu0 %v4990_v0  ;;  %v5087_v0 = vld [vmem:[%s7381_s2 + $0x58c] ss:$16 sps:$4 sm:$0xff]  }
  0x78   :  { %1456 = vmatpush2.bf16.msra.mxu1 %v4987_v63  ;;  %1379 = vmatprep.subr.bf16.mxu0 %v4998_v2  ;;  %v5082_v63 = vld [vmem:[%s7381_s2 + $0x368] ss:$16 sps:$4 sm:$0xff]  }
  0x79   :  { %1457 = vmatprep.subr.bf16.mxu1 %v4995_v1  ;;  %v5090_v1 = vld [vmem:[%s7381_s2 + $0x34c] ss:$16 sps:$4 sm:$0xff]   ;;  %v5085_v2 = vld [vmem:[%s7381_s2 + $0x588] ss:$16 sps:$4 sm:$0xff]  }
  0x7b   :  { %1380 = vmatpush2.bf16.msra.mxu0 %v4996_v4  ;;  %v5093_v4 = vld [vmem:[%s7381_s2 + $0x56c] ss:$16 sps:$4 sm:$0xff]  }
  0x7c   :  { %1458 = vmatpush2.bf16.msra.mxu1 %v4993_v3  ;;  %1381 = vmatprep.subr.bf16.mxu0 %v5004_v8  ;;  %v5088_v3 = vld [vmem:[%s7381_s2 + $0x348] ss:$16 sps:$4 sm:$0xff]  }
  0x7d   :  { %1459 = vmatprep.subr.bf16.mxu1 %v5001_v5  ;;  %v5096_v5 = vld [vmem:[%s7381_s2 + $0x32c] ss:$16 sps:$4 sm:$0xff]   ;;  %v5091_v8 = vld [vmem:[%s7381_s2 + $0x568] ss:$16 sps:$4 sm:$0xff]  }
  0x7f   :  { %1382 = vmatpush2.bf16.msra.mxu0 %v5002_v10  ;;  %v5099_v10 = vld [vmem:[%s7381_s2 + $0x54c] ss:$16 sps:$4 sm:$0xff]  }
  0x80   :  { %1460 = vmatpush2.bf16.msra.mxu1 %v4999_v9  ;;  %1474 = vmatprep.subr.bf16.mxu0 %v5012_v12  ;;  %v5094_v9 = vld [vmem:[%s7381_s2 + $0x328] ss:$16 sps:$4 sm:$0xff]  }
  0x81   :  { %1461 = vmatprep.subr.bf16.mxu1 %v5009_v11  ;;  %v5102_v11 = vld [vmem:[%s7381_s2 + $0x30c] ss:$16 sps:$4 sm:$0xff]   ;;  %v5097_v12 = vld [vmem:[%s7381_s2 + $0x548] ss:$16 sps:$4 sm:$0xff]  }
  0x82   :  { %1384 = vmatmul.mubr.bf16.vlgmr.msra.gmra.mxu0 %v6111_v14 }
  0x83   :  { %1475 = vmatpush1.bf16.msra.mxu0 %v5010_v16  ;;  %1506 = vmatprep.mubr.bf16.mxu0 %v5843_v51  ;;  %v5028_v51 = vld [vmem:[%s7381_s2 + $0x288] ss:$16 sps:$4 sm:$0xff]   ;;  %v5105_v16 = vld [vmem:[%s7381_s2 + $0x52c] ss:$16 sps:$4 sm:$0xff]  }
  0x84   :  { %1462 = vmatpush2.bf16.msra.mxu1 %v5007_v15  ;;  %1476 = vmatprep.subr.bf16.mxu0 %v5018_v18  ;;  %v5100_v15 = vld [vmem:[%s7381_s2 + $0x308] ss:$16 sps:$4 sm:$0xff]  }
  0x85   :  { %1463 = vmatprep.subr.bf16.mxu1 %v5015_v17  ;;  %v5108_v17 = vld [vmem:[%s7381_s2 + $0x60c] ss:$16 sps:$4 sm:$0xff]   ;;  %v5103_v18 = vld [vmem:[%s7381_s2 + $0x528] ss:$16 sps:$4 sm:$0xff]  }
  0x87   :  { %1477 = vmatpush1.bf16.msra.mxu0 %v5016_v20  ;;  %v5111_v20 = vld [vmem:[%s7381_s2 + $0x50c] ss:$16 sps:$4 sm:$0xff]  }
  0x88   :  { %1464 = vmatpush2.bf16.msra.mxu1 %v5013_v19  ;;  %1478 = vmatprep.subr.bf16.mxu0 %v5024_v22  ;;  %v5106_v19 = vld [vmem:[%s7381_s2 + $0x608] ss:$16 sps:$4 sm:$0xff]  }
  0x89   :  { %1515 = vmatprep.subr.bf16.mxu1 %v5021_v21  ;;  %v5114_v21 = vld [vmem:[%s7383_s4 + $0x74] ss:$8 sps:$4 sm:$0xff]   ;;  %v5109_v22 = vld [vmem:[%s7381_s2 + $0x508] ss:$16 sps:$4 sm:$0xff]  }
  0x8b   :  { %1466 = vmatmul.mubr.bf16.vlgmr.msra.gmra.mxu1 %v5901_v6  ;;  %1479 = vmatpush1.bf16.msra.mxu0 %v5022_v24  ;;  %v5034_v6 = vld [vmem:[%s7381_s2 + $0x268] ss:$16 sps:$4 sm:$0xff]   ;;  %v5117_v24 = vld [vmem:[%s7383_s4 + $0x64] ss:$8 sps:$4 sm:$0xff]  }
  0x8c   :  { %1516 = vmatpush1.bf16.msra.mxu1 %v5019_v23  ;;  %1480 = vmatprep.subr.bf16.mxu0 %v5030_v26  ;;  %v5112_v23 = vld [vmem:[%s7383_s4 + $0x70] ss:$8 sps:$4 sm:$0xff]   ;;  %v5120_v26 = vld [vmem:[%s7383_s4 + $0x54] ss:$8 sps:$4 sm:$0xff]  }
  0x8d   :  { %1517 = vmatprep.subr.bf16.mxu1 %v5027_v25  ;;  %1547 = vmatprep.mubr.bf16.mxu1 %v5986_v33  ;;  %v5037_v33 = vld [vmem:[%s7381_s2 + $0x488] ss:$16 sps:$4 sm:$0xff]  }
  0x8e   :  { %v5606_v25 = vld [vmem:[%s7379_s0 + $0x18] ss:$0 sps:$4 sm:$0xff]  }
  0x8f   :  { %1481 = vmatpush1.bf16.msra.mxu0 %v5028_v51  ;;  %v5160_v51 = vld [vmem:[%s7383_s4 + $0x170] ss:$8 sps:$4 sm:$0xff]  }
  0x90   :  { %1518 = vmatpush1.bf16.msra.mxu1 %v5025_v27  ;;  %1482 = vmatprep.subr.bf16.mxu0 %v5036_v29  ;;  %v5118_v27 = vld [vmem:[%s7383_s4 + $0x50] ss:$8 sps:$4 sm:$0xff]   ;;  %v5165_v29 = vld [vmem:[%s7383_s4 + $0x164] ss:$8 sps:$4 sm:$0xff]  }
  0x91   :  { %1519 = vmatprep.subr.bf16.mxu1 %v5033_v28  ;;  %v5162_v28 = vld [vmem:[%s7383_s4 + $0x174] ss:$8 sps:$4 sm:$0xff]  }
  0x93   :  { %1483 = vmatpush1.bf16.msra.mxu0 %v5034_v6  ;;  %v5163_v6 = vld [vmem:[%s7383_s4 + $0x160] ss:$8 sps:$4 sm:$0xff]  }
  0x94   :  { %1520 = vmatpush1.bf16.msra.mxu1 %v5031_v30  ;;  %1484 = vmatprep.subr.bf16.mxu0 %v5042_v32  ;;  %v5121_v30 = vld [vmem:[%s7383_s4 + $0x40] ss:$8 sps:$4 sm:$0xff]   ;;  %v5168_v32 = vld [vmem:[%s7383_s4 + $0x154] ss:$8 sps:$4 sm:$0xff]  }
  0x95   :  { %1521 = vmatprep.subr.bf16.mxu1 %v5039_v31  ;;  %v5126_v31 = vld [vmem:[%s7383_s4 + $0x34] ss:$8 sps:$4 sm:$0xff]  }
  0x97   :  { %1485 = vmatpush1.bf16.msra.mxu0 %v5040_v34  ;;  %v5129_v34 = vld [vmem:[%s7383_s4 + $0x24] ss:$8 sps:$4 sm:$0xff]  }
  0x98   :  { %1522 = vmatpush1.bf16.msra.mxu1 %v5037_v33  ;;  %1486 = vmatprep.subr.bf16.mxu0 %v5048_v36  ;;  %v5124_v33 = vld [vmem:[%s7383_s4 + $0x30] ss:$8 sps:$4 sm:$0xff]   ;;  %v5171_v36 = vld [vmem:[%s7383_s4 + $0x144] ss:$8 sps:$4 sm:$0xff]  }
  0x99   :  { %1523 = vmatprep.subr.bf16.mxu1 %v5045_v35  ;;  %v5166_v35 = vld [vmem:[%s7383_s4 + $0x150] ss:$8 sps:$4 sm:$0xff]  }
  0x9b   :  { %1487 = vmatpush1.bf16.msra.mxu0 %v5046_v38  ;;  %v5169_v38 = vld [vmem:[%s7383_s4 + $0x140] ss:$8 sps:$4 sm:$0xff]  }
  0x9c   :  { %1524 = vmatpush1.bf16.msra.mxu1 %v5043_v37  ;;  %1488 = vmatprep.subr.bf16.mxu0 %v5054_v40  ;;  %v5127_v37 = vld [vmem:[%s7383_s4 + $0x20] ss:$8 sps:$4 sm:$0xff]   ;;  %v5174_v40 = vld [vmem:[%s7383_s4 + $0x134] ss:$8 sps:$4 sm:$0xff]  }
  0x9d   :  { %1525 = vmatprep.subr.bf16.mxu1 %v5051_v39  ;;  %v5132_v39 = vld [vmem:[%s7383_s4 + $0x14] ss:$8 sps:$4 sm:$0xff]  }
  0x9f   :  { %1489 = vmatpush1.bf16.msra.mxu0 %v5052_v42  ;;  %v5172_v42 = vld [vmem:[%s7383_s4 + $0x130] ss:$8 sps:$4 sm:$0xff]  }
  0xa0   :  { %1526 = vmatpush1.bf16.msra.mxu1 %v5049_v41  ;;  %1490 = vmatprep.subr.bf16.mxu0 %v5060_v44  ;;  %v5130_v41 = vld [vmem:[%s7383_s4 + $0x10] ss:$8 sps:$4 sm:$0xff]   ;;  %v5177_v44 = vld [vmem:[%s7383_s4 + $0x124] ss:$8 sps:$4 sm:$0xff]  }
  0xa1   :  { %1527 = vmatprep.subr.bf16.mxu1 %v5057_v43  ;;  %v5135_v43 = vld [vmem:[%s7383_s4 + $0x4] ss:$8 sps:$4 sm:$0xff]  }
  0xa3   :  { %1491 = vmatpush2.bf16.msra.mxu0 %v5058_v46  ;;  %v5175_v46 = vld [vmem:[%s7383_s4 + $0x120] ss:$8 sps:$4 sm:$0xff]  }
  0xa4   :  { %1528 = vmatpush1.bf16.msra.mxu1 %v5055_v45  ;;  %1492 = vmatprep.subr.bf16.mxu0 %v5066_v48  ;;  %v5133_v45 = vld [vmem:[%s7383_s4] ss:$8 sps:$4 sm:$0xff]   ;;  %v5180_v48 = vld [vmem:[%s7383_s4 + $0x114] ss:$8 sps:$4 sm:$0xff]  }
  0xa5   :  { %1529 = vmatprep.subr.bf16.mxu1 %v5063_v47  ;;  %v5138_v47 = vld [vmem:[%s7383_s4 + $0xf4] ss:$8 sps:$4 sm:$0xff]  }
  0xa7   :  { %1493 = vmatpush2.bf16.msra.mxu0 %v5064_v50  ;;  %v5178_v50 = vld [vmem:[%s7383_s4 + $0x110] ss:$8 sps:$4 sm:$0xff]  }
  0xa8   :  { %1530 = vmatpush1.bf16.msra.mxu1 %v5061_v49  ;;  %1494 = vmatprep.subr.bf16.mxu0 %v5072_v53  ;;  %v5136_v49 = vld [vmem:[%s7383_s4 + $0xf0] ss:$8 sps:$4 sm:$0xff]   ;;  %v5183_v53 = vld [vmem:[%s7383_s4 + $0x104] ss:$8 sps:$4 sm:$0xff]  }
  0xa9   :  { %1531 = vmatprep.subr.bf16.mxu1 %v5069_v52  ;;  %v5141_v52 = vld [vmem:[%s7383_s4 + $0xe4] ss:$8 sps:$4 sm:$0xff]  }
  0xab   :  { %1495 = vmatpush2.bf16.msra.mxu0 %v5070_v55  ;;  %v5181_v55 = vld [vmem:[%s7383_s4 + $0x100] ss:$8 sps:$4 sm:$0xff]  }
  0xac   :  { %1532 = vmatpush2.bf16.msra.mxu1 %v5067_v54  ;;  %1496 = vmatprep.subr.bf16.mxu0 %v5078_v57  ;;  %v5139_v54 = vld [vmem:[%s7383_s4 + $0xe0] ss:$8 sps:$4 sm:$0xff]   ;;  %v5186_v57 = vld [vmem:[%s7383_s4 + $0x1f4] ss:$8 sps:$4 sm:$0xff]  }
  0xad   :  { %1533 = vmatprep.subr.bf16.mxu1 %v5075_v56  ;;  %v5144_v56 = vld [vmem:[%s7383_s4 + $0xd4] ss:$8 sps:$4 sm:$0xff]  }
  0xaf   :  { %1497 = vmatpush2.bf16.msra.mxu0 %v5076_v59  ;;  %v5184_v59 = vld [vmem:[%s7383_s4 + $0x1f0] ss:$8 sps:$4 sm:$0xff]  }
  0xb0   :  { %1534 = vmatpush2.bf16.msra.mxu1 %v5073_v58  ;;  %1498 = vmatprep.subr.bf16.mxu0 %v5084_v61  ;;  %v5142_v58 = vld [vmem:[%s7383_s4 + $0xd0] ss:$8 sps:$4 sm:$0xff]   ;;  %v5189_v61 = vld [vmem:[%s7383_s4 + $0x1e4] ss:$8 sps:$4 sm:$0xff]  }
  0xb1   :  { %1535 = vmatprep.subr.bf16.mxu1 %v5081_v60  ;;  %v5147_v60 = vld [vmem:[%s7383_s4 + $0xc4] ss:$8 sps:$4 sm:$0xff]  }
  0xb3   :  { %1499 = vmatpush2.bf16.msra.mxu0 %v5082_v63  ;;  %v5187_v63 = vld [vmem:[%s7383_s4 + $0x1e0] ss:$8 sps:$4 sm:$0xff]  }
  0xb4   :  { %1536 = vmatpush2.bf16.msra.mxu1 %v5079_v62  ;;  %1500 = vmatprep.subr.bf16.mxu0 %v5090_v1  ;;  %v5145_v62 = vld [vmem:[%s7383_s4 + $0xc0] ss:$8 sps:$4 sm:$0xff]   ;;  %v5192_v1 = vld [vmem:[%s7383_s4 + $0x1d4] ss:$8 sps:$4 sm:$0xff]  }
  0xb5   :  { %1537 = vmatprep.subr.bf16.mxu1 %v5087_v0  ;;  %v5150_v0 = vld [vmem:[%s7383_s4 + $0xb4] ss:$8 sps:$4 sm:$0xff]  }
  0xb7   :  { %1501 = vmatpush2.bf16.msra.mxu0 %v5088_v3  ;;  %v5190_v3 = vld [vmem:[%s7383_s4 + $0x1d0] ss:$8 sps:$4 sm:$0xff]  }
  0xb8   :  { %1538 = vmatpush2.bf16.msra.mxu1 %v5085_v2  ;;  %1502 = vmatprep.subr.bf16.mxu0 %v5096_v5  ;;  %v5148_v2 = vld [vmem:[%s7383_s4 + $0xb0] ss:$8 sps:$4 sm:$0xff]   ;;  %v5195_v5 = vld [vmem:[%s7383_s4 + $0x1c4] ss:$8 sps:$4 sm:$0xff]  }
  0xb9   :  { %1539 = vmatprep.subr.bf16.mxu1 %v5093_v4  ;;  %v5153_v4 = vld [vmem:[%s7383_s4 + $0xa4] ss:$8 sps:$4 sm:$0xff]  }
  0xbb   :  { %1503 = vmatpush2.bf16.msra.mxu0 %v5094_v9  ;;  %v5193_v9 = vld [vmem:[%s7383_s4 + $0x1c0] ss:$8 sps:$4 sm:$0xff]  }
  0xbc   :  { %1540 = vmatpush2.bf16.msra.mxu1 %v5091_v8  ;;  %1504 = vmatprep.subr.bf16.mxu0 %v5102_v11  ;;  %v5151_v8 = vld [vmem:[%s7383_s4 + $0xa0] ss:$8 sps:$4 sm:$0xff]   ;;  %v5154_v11 = vld [vmem:[%s7383_s4 + $0x90] ss:$8 sps:$4 sm:$0xff]  }
  0xbd   :  { %1541 = vmatprep.subr.bf16.mxu1 %v5099_v10  ;;  %v5156_v10 = vld [vmem:[%s7383_s4 + $0x94] ss:$8 sps:$4 sm:$0xff]  }
  0xbf   :  { %1505 = vmatpush2.bf16.msra.mxu0 %v5100_v15  ;;  %v5157_v15 = vld [vmem:[%s7383_s4 + $0x80] ss:$8 sps:$4 sm:$0xff]  }
  0xc0   :  { %1542 = vmatpush2.bf16.msra.mxu1 %v5097_v12  ;;  %1570 = vmatprep.subr.bf16.mxu0 %v5108_v17  ;;  %v5159_v12 = vld [vmem:[%s7383_s4 + $0x84] ss:$8 sps:$4 sm:$0xff]  }
  0xc1   :  { %1543 = vmatprep.subr.bf16.mxu1 %v5105_v16 }
  0xc2   :  { %1507 = vmatmul.mubr.bf16.vlgmr.msra.gmra.mxu0 %v5903_v7  ;;  %v5115_v7 = vld [vmem:[%s7383_s4 + $0x60] ss:$8 sps:$4 sm:$0xff]  }
  0xc3   :  { %1571 = vmatpush1.bf16.msra.mxu0 %v5106_v19  ;;  %1588 = vmatprep.mubr.bf16.mxu0 %v5629_v13 }
  0xc4   :  { %1544 = vmatpush2.bf16.msra.mxu1 %v5103_v18  ;;  %2001 = vmatprep.subr.bf16.mxu0 %v5114_v21  ;;  %v5196_v21 = vld [vmem:[%s7383_s4 + $0x1b0] ss:$8 sps:$4 sm:$0xff]  }
  0xc5   :  { %1545 = vmatprep.subr.bf16.mxu1 %v5111_v20  ;;  %v5198_v20 = vld [vmem:[%s7383_s4 + $0x1b4] ss:$8 sps:$4 sm:$0xff]  }
  0xc8   :  { %1546 = vmatpush2.bf16.msra.mxu1 %v5109_v22 }
  0xc9   :  { %2042 = vmatprep.subr.bf16.mxu1 %v5162_v28  ;;  %v5202_v28 = vld [vmem:[%s7383_s4 + $0x190] ss:$8 sps:$4 sm:$0xff]  }
  0xca   :  { %4437 = vmatmul.mubr.msk.bf16.vlgmr.msra.gmra.mxu0 %vm1265_vm0, %v5606_v25  ;;  %v5201_v25 = vld [vmem:[%s7383_s4 + $0x1a4] ss:$8 sps:$4 sm:$0xff]  }
  0xcb   :  { %1548 = vmatmul.mubr.bf16.vlgmr.msra.gmra.mxu1 %v6111_v14  ;;  %2002 = vmatpush1.bf16.msra.mxu0 %v5112_v23  ;;  %v5123_v14 = vld [vmem:[%s7383_s4 + $0x44] ss:$8 sps:$4 sm:$0xff]  }
  0xcc   :  { %2003 = vmatprep.subr.bf16.mxu0 %v5117_v24  ;;  %2043 = vmatpush1.bf16.msra.mxu1 %v5160_v51  ;;  %v5204_v51 = vld [vmem:[%s7383_s4 + $0x194] ss:$8 sps:$4 sm:$0xff]  }
  0xcd   :  { %2044 = vmatprep.subr.bf16.mxu1 %v5165_v29 }
  0xcf   :  { %2004 = vmatpush1.bf16.msra.mxu0 %v5115_v7 }
  0xd0   :  { %2005 = vmatprep.subr.bf16.mxu0 %v5120_v26  ;;  %2045 = vmatpush1.bf16.msra.mxu1 %v5163_v6  ;;  %v5199_v26 = vld [vmem:[%s7383_s4 + $0x1a0] ss:$8 sps:$4 sm:$0xff]  }
  0xd1   :  { %2046 = vmatprep.subr.bf16.mxu1 %v5168_v32 }
  0xd3   :  { %2006 = vmatpush1.bf16.msra.mxu0 %v5118_v27 }
  0xd4   :  { %2007 = vmatprep.subr.bf16.mxu0 %v5123_v14  ;;  %2047 = vmatpush1.bf16.msra.mxu1 %v5166_v35 }
  0xd5   :  { %2048 = vmatprep.subr.bf16.mxu1 %v5171_v36 }
  0xd7   :  { %2008 = vmatpush1.bf16.msra.mxu0 %v5121_v30 }
  0xd8   :  { %2009 = vmatprep.subr.bf16.mxu0 %v5126_v31  ;;  %2049 = vmatpush1.bf16.msra.mxu1 %v5169_v38 }
  0xd9   :  { %2050 = vmatprep.subr.bf16.mxu1 %v5174_v40 }
  0xdb   :  { %2010 = vmatpush1.bf16.msra.mxu0 %v5124_v33 }
  0xdc   :  { %2011 = vmatprep.subr.bf16.mxu0 %v5129_v34  ;;  %2051 = vmatpush1.bf16.msra.mxu1 %v5172_v42 }
  0xdd   :  { %2052 = vmatprep.subr.bf16.mxu1 %v5177_v44 }
  0xdf   :  { %2012 = vmatpush1.bf16.msra.mxu0 %v5127_v37 }
  0xe0   :  { %2013 = vmatprep.subr.bf16.mxu0 %v5132_v39  ;;  %2053 = vmatpush1.bf16.msra.mxu1 %v5175_v46 }
  0xe1   :  { %2054 = vmatprep.subr.bf16.mxu1 %v5180_v48 }
  0xe3   :  { %2014 = vmatpush1.bf16.msra.mxu0 %v5130_v41 }
  0xe4   :  { %2015 = vmatprep.subr.bf16.mxu0 %v5135_v43  ;;  %2055 = vmatpush1.bf16.msra.mxu1 %v5178_v50 }
  0xe5   :  { %2056 = vmatprep.subr.bf16.mxu1 %v5183_v53 }
  0xe7   :  { %2016 = vmatpush1.bf16.msra.mxu0 %v5133_v45 }
  0xe8   :  { %2017 = vmatprep.subr.bf16.mxu0 %v5138_v47  ;;  %2057 = vmatpush1.bf16.msra.mxu1 %v5181_v55 }
  0xe9   :  { %2058 = vmatprep.subr.bf16.mxu1 %v5186_v57 }
  0xeb   :  { %2018 = vmatpush2.bf16.msra.mxu0 %v5136_v49 }
  0xec   :  { %2019 = vmatprep.subr.bf16.mxu0 %v5141_v52  ;;  %2059 = vmatpush2.bf16.msra.mxu1 %v5184_v59 }
  0xed   :  { %2060 = vmatprep.subr.bf16.mxu1 %v5189_v61 }
  0xef   :  { %2020 = vmatpush2.bf16.msra.mxu0 %v5139_v54 }
  0xf0   :  { %2021 = vmatprep.subr.bf16.mxu0 %v5144_v56  ;;  %2061 = vmatpush2.bf16.msra.mxu1 %v5187_v63 }
  0xf1   :  { %2062 = vmatprep.subr.bf16.mxu1 %v5192_v1 }
  0xf3   :  { %2022 = vmatpush2.bf16.msra.mxu0 %v5142_v58 }
  0xf4   :  { %2023 = vmatprep.subr.bf16.mxu0 %v5147_v60  ;;  %2063 = vmatpush2.bf16.msra.mxu1 %v5190_v3 }
  0xf5   :  { %2064 = vmatprep.subr.bf16.mxu1 %v5195_v5 }
  0xf7   :  { %2024 = vmatpush2.bf16.msra.mxu0 %v5145_v62 }
  0xf8   :  { %2025 = vmatprep.subr.bf16.mxu0 %v5150_v0  ;;  %2065 = vmatpush2.bf16.msra.mxu1 %v5193_v9 }
  0xf9   :  { %2066 = vmatprep.subr.bf16.mxu1 %v5198_v20 }
  0xfb   :  { %2026 = vmatpush2.bf16.msra.mxu0 %v5148_v2 }
  0xfc   :  { %2027 = vmatprep.subr.bf16.mxu0 %v5153_v4  ;;  %2067 = vmatpush2.bf16.msra.mxu1 %v5196_v21 }
  0xfd   :  { %2068 = vmatprep.subr.bf16.mxu1 %v5201_v25 }
  0xff   :  { %2028 = vmatpush2.bf16.msra.mxu0 %v5151_v8 }
 0x100   :  { %2029 = vmatprep.subr.bf16.mxu0 %v5156_v10  ;;  %2069 = vmatpush2.bf16.msra.mxu1 %v5199_v26 }
 0x102   :  { %v1303_v16 = vpop.f32.mrf.mxu0 }
 0x103   :  { %v1344_v17 = vpop.f32.mrf.mxu1  ;;  %2030 = vmatpush2.bf16.msra.mxu0 %v5154_v11 }
 0x104   :  { %v1305_v18 = vpop.f32.mrf.mxu0  ;;  %2031 = vmatprep.subr.bf16.mxu0 %v5159_v12 }
 0x105   :  { %v1346_v19 = vpop.f32.mrf.mxu1 }
 0x106   :  { %v1307_v22 = vpop.f32.mrf.mxu0 }
 0x107   :  { %v1348_v23 = vpop.f32.mrf.mxu1  ;;  %2032 = vmatpush2.bf16.msra.mxu0 %v5157_v15 }
 0x108   :  { %v1308_v24 = vpop.f32.mrf.mxu0 }
 0x109   :  { %v1349_v7 = vpop.f32.mrf.mxu1 }
 0x10b   :  { %v1426_v27 = vpop.f32.mrf.mxu1 }
 0x10d   :  { %v1428_v14 = vpop.f32.mrf.mxu1 }
 0x10e   :  { %17 = vsyncpa [#allocation3], 0  ;;  %2070 = vmatprep.subr.bf16.mxu1 %v5204_v51  ;;  %v5207_v6 = vld [vmem:[%s7383_s4 + $0x184] ss:$8 sps:$4 sm:$0xff]   ;;  %v5205_v31 = vld [vmem:[%s7383_s4 + $0x180] ss:$8 sps:$4 sm:$0xff]   ;;  %v241_v32 = vlaneseq }
 0x10f   :  { %v1430_v29 = vpop.f32.mrf.mxu1  ;;  %2071 = vmatpush2.bf16.msra.mxu1 %v5202_v28  ;;  %v239_v35 = vld [vmem:[%s7382_s3] sm:$0xf]  ;;  %v5211_v51 = vld [vmem:[%s7385_s6 + $0xe8] ss:$16 sps:$4 sm:$0xff]   ;;  %v5213_v28 = vld [vmem:[%s7385_s6 + $0xec] ss:$16 sps:$4 sm:$0xff]  }
 0x110   :  { %2072 = vmatprep.subr.bf16.mxu1 %v5207_v6  ;;  %v6520_v33 = vshrl.u32 %v241_v32, 7  ;;  %v5216_v29 = vld [vmem:[%s7385_s6 + $0xc4] ss:$16 sps:$4 sm:$0xff]   ;;  %v5214_v6 = vld [vmem:[%s7385_s6 + $0xc0] ss:$16 sps:$4 sm:$0xff]  }
 0x111   :  { %v1431_v30 = vpop.f32.mrf.mxu1  ;;  %v5222_v32 = vld [vmem:[%s7385_s6 + $0xa4] ss:$16 sps:$4 sm:$0xff]  }
 0x112   :  { %v6523_v34 = vsub.s32 0, %v6520_v33  ;;  %v6529_v36 = vsub.s32 1, %v6520_v33  ;;  %v6535_v60 = vsub.s32 2, %v6520_v33  ;;  %v6538_v61 = vsub.s32 3, %v6520_v33  ;;  %v5219_v30 = vld [vmem:[%s7385_s6 + $0xcc] ss:$16 sps:$4 sm:$0xff]  }
 0x113   :  { %2073 = vmatpush2.bf16.msra.mxu1 %v5205_v31  ;;  %v5217_v31 = vld [vmem:[%s7385_s6 + $0xc8] ss:$16 sps:$4 sm:$0xff]  }
 0x114   :  { %v244_v37 = vrot.slane %v239_v35, %v6523_v34  ;;  %v248_v38 = vrot.slane %v239_v35, %v6529_v36  ;;  %v252_v63 = vrot.slane %v239_v35, %v6535_v60  ;;  %v256_v1 = vrot.slane %v239_v35, %v6538_v61  ;;  %2344 = vmatprep.subr.bf16.mxu1 %v5213_v28  ;;  %v5225_v35 = vld [vmem:[%s7385_s6 + $0xac] ss:$16 sps:$4 sm:$0xff]  }
 0x115   :  { %v5273_v28 = vld [vmem:[%s7387_s8 + $0x49c] ss:$28 sps:$4 sm:$0xff]  }
 0x116   :  { %v1304_v39 = vadd.f32 %v1303_v16, %v244_v37  ;;  %v1306_v40 = vadd.f32 %v1305_v18, %v248_v38  ;;  %v5220_v37 = vld [vmem:[%s7385_s6 + $0xa0] ss:$16 sps:$4 sm:$0xff]   ;;  %v5223_v38 = vld [vmem:[%s7385_s6 + $0xa8] ss:$16 sps:$4 sm:$0xff]  }
 0x118   :  { %v1345_v41 = vadd.f32 %v1344_v17, %v1304_v39  ;;  %v1347_v43 = vadd.f32 %v1346_v19, %v1306_v40  ;;  %v5231_v39 = vld [vmem:[%s7385_s6 + $0x8c] ss:$16 sps:$4 sm:$0xff]   ;;  %v5226_v40 = vld [vmem:[%s7385_s6 + $0x80] ss:$16 sps:$4 sm:$0xff]  }
 0x142   :  { %v1385_v42 = vpop.f32.mrf.mxu0 }
 0x143   :  { %v1386_v44 = vadd.f32 %v1385_v42, %v1345_v41  ;;  %v5229_v41 = vld [vmem:[%s7385_s6 + $0x88] ss:$16 sps:$4 sm:$0xff]   ;;  %v5234_v42 = vld [vmem:[%s7385_s6 + $0x64] ss:$16 sps:$4 sm:$0xff]  }
 0x144   :  { %v1387_v45 = vpop.f32.mrf.mxu0 }
 0x145   :  { %v1427_v46 = vadd.f32 %v1426_v27, %v1386_v44  ;;  %v1388_v47 = vadd.f32 %v1387_v45, %v1347_v43  ;;  %v5208_v27 = vld [vmem:[%s7385_s6 + $0xe0] ss:$16 sps:$4 sm:$0xff]   ;;  %v5235_v44 = vld [vmem:[%s7385_s6 + $0x68] ss:$16 sps:$4 sm:$0xff]   ;;  %v5237_v45 = vld [vmem:[%s7385_s6 + $0x6c] ss:$16 sps:$4 sm:$0xff]  }
 0x146   :  { %v1389_v48 = vpop.f32.mrf.mxu0  ;;  %v5232_v43 = vld [vmem:[%s7385_s6 + $0x60] ss:$16 sps:$4 sm:$0xff]  }
 0x147   :  { %v1429_v49 = vadd.f32 %v1428_v14, %v1388_v47  ;;  %v1597_v50 = vmax.f32 %v1427_v46, 0.0  ;;  %v5210_v14 = vld [vmem:[%s7385_s6 + $0xe4] ss:$16 sps:$4 sm:$0xff]   ;;  %v5243_v47 = vld [vmem:[%s7385_s6 + $0x4c] ss:$16 sps:$4 sm:$0xff]  }
 0x148   :  { %v1390_v52 = vpop.f32.mrf.mxu0  ;;  %2303 = vmatprep.subr.bf16.mxu0 %v5210_v14  ;;  %v5240_v46 = vld [vmem:[%s7385_s6 + $0x44] ss:$16 sps:$4 sm:$0xff]   ;;  %v5238_v48 = vld [vmem:[%s7385_s6 + $0x40] ss:$16 sps:$4 sm:$0xff]  }
 0x149   :  { %v1598_v53 = vmax.f32 %v1429_v49, 0.0  ;;  %v1601_v56 = vpack.c.bf16 %v1597_v50, %v1597_v50  ;;  %v5241_v49 = vld [vmem:[%s7385_s6 + $0x48] ss:$16 sps:$4 sm:$0xff]   ;;  %v5246_v50 = vld [vmem:[%s7385_s6 + $0x24] ss:$16 sps:$4 sm:$0xff]  }
 0x14a   :  { %v5249_v52 = vld [vmem:[%s7385_s6 + $0x2c] ss:$16 sps:$4 sm:$0xff]  }
 0x14b   :  { %v1467_v54 = vpop.f32.mrf.mxu1  ;;  %v1602_v55 = vpack.c.bf16 %v1598_v53, %v1598_v53  ;;  %v5244_v53 = vld [vmem:[%s7385_s6 + $0x20] ss:$16 sps:$4 sm:$0xff]  }
 0x14c   :  { %v1468_v3 = vadd.f32 %v1467_v54, %v252_v63  ;;  %v5247_v54 = vld [vmem:[%s7385_s6 + $0x28] ss:$16 sps:$4 sm:$0xff]   ;;  %v5265_v14 = vld [vmem:[%s7387_s8 + $0x4d0] ss:$28 sps:$4 sm:$0xff]  }
 0x14d   :  { %v1469_v57 = vpop.f32.mrf.mxu1  ;;  %2033 = vmatprep.mubr.bf16.mxu0 %v1602_v55  ;;  %v5252_v55 = vld [vmem:[%s7385_s6 + $0x4] ss:$16 sps:$4 sm:$0xff]  }
 0x14e   :  { %2034 = vmatmul.mubr.bf16.vlgmr.msra.gmra.mxu0 %v1601_v56  ;;  %v1470_v5 = vadd.f32 %v1469_v57, %v256_v1  ;;  %v5255_v56 = vld [vmem:[%s7385_s6 + $0xc] ss:$16 sps:$4 sm:$0xff]   ;;  %v5250_v57 = vld [vmem:[%s7385_s6] ss:$16 sps:$4 sm:$0xff]  }
 0x14f   :  { %v1471_v58 = vpop.f32.mrf.mxu1  ;;  %2335 = vmatprep.mubr.bf16.mxu0 %v5629_v13  ;;  %2304 = vmatpush1.bf16.msra.mxu0 %v5208_v27  ;;  %v5262_v27 = vld [vmem:[%s7387_s8 + $0x150] ss:$28 sps:$4 sm:$0xff]  }
 0x150   :  { %2305 = vmatprep.subr.bf16.mxu0 %v5216_v29  ;;  %v5253_v58 = vld [vmem:[%s7385_s6 + $0x8] ss:$16 sps:$4 sm:$0xff]  }
 0x151   :  { %v1472_v59 = vpop.f32.mrf.mxu1  ;;  %v5268_v29 = vld [vmem:[%s7387_s8 + $0x118] ss:$28 sps:$4 sm:$0xff]  }
 0x152   :  { %v5258_v59 = vld [vmem:[%s7387_s8 + $0x18c] ss:$28 sps:$4 sm:$0xff]  }
 0x153   :  { %2306 = vmatpush1.bf16.msra.mxu0 %v5214_v6  ;;  %v5276_v6 = vld [vmem:[%s7387_s8 + $0xe4] ss:$28 sps:$4 sm:$0xff]  }
 0x154   :  { %2307 = vmatprep.subr.bf16.mxu0 %v5222_v32  ;;  %v5274_v32 = vld [vmem:[%s7387_s8 + $0xe0] ss:$28 sps:$4 sm:$0xff]  }
 0x157   :  { %2308 = vmatpush1.bf16.msra.mxu0 %v5220_v37  ;;  %v5282_v37 = vld [vmem:[%s7387_s8 + $0xac] ss:$28 sps:$4 sm:$0xff]  }
 0x182   :  { %v1508_v62 = vpop.f32.mrf.mxu0 }
 0x183   :  { %v1509_v8 = vadd.f32 %v1508_v62, %v1468_v3  ;;  %v5261_v62 = vld [vmem:[%s7387_s8 + $0x50c] ss:$28 sps:$4 sm:$0xff]   ;;  %v1669_v3 = vld [vmem:[%s7384_s5] sm:$0x3] }
 0x184   :  { %v1510_v0 = vpop.f32.mrf.mxu0 }
 0x185   :  { %v1511_v11 = vadd.f32 %v1510_v0, %v1470_v5  ;;  %v1678_v5 = vrot.slane %v1669_v3, %v6529_v36 }
 0x186   :  { %v1512_v2 = vpop.f32.mrf.mxu0 }
 0x188   :  { %v1513_v4 = vpop.f32.mrf.mxu0 }
 0x189   :  { %v1674_v4 = vrot.slane %v1669_v3, %v6523_v34  ;;  %v5324_v3 = vld [vmem:[%s7387_s8 + $0x2a4] ss:$28 sps:$4 sm:$0xff]  }
 0x18a   :  { %v1590_v10 = vpop.f32.mrf.mxu0 }
 0x18b   :  { %v1549_v9 = vpop.f32.mrf.mxu1 }
 0x18c   :  { %v1550_v12 = vadd.f32 %v1549_v9, %v1509_v8  ;;  %v1592_v16 = vpop.f32.mrf.mxu0 }
 0x18d   :  { %v1551_v15 = vpop.f32.mrf.mxu1 }
 0x18e   :  { %v1591_v17 = vadd.f32 %v1590_v10, %v1550_v12  ;;  %v1552_v18 = vadd.f32 %v1551_v15, %v1511_v11  ;;  %v1594_v20 = vpop.f32.mrf.mxu0 }
 0x18f   :  { %v1553_v19 = vpop.f32.mrf.mxu1 }
 0x190   :  { %v1593_v21 = vadd.f32 %v1592_v16, %v1552_v18  ;;  %v1599_v22 = vmax.f32 %v1591_v17, 0.0  ;;  %v1595_v24 = vpop.f32.mrf.mxu0  ;;  %v2085_v19 = vld [vmem:[%s7380_s1] sm:$0xff] }
 0x191   :  { %v1554_v23 = vpop.f32.mrf.mxu1  ;;  %v5259_v24 = vld [vmem:[%s7387_s8 + $0x508] ss:$28 sps:$4 sm:$0xff]  }
 0x192   :  { %v1600_v7 = vmax.f32 %v1593_v21, 0.0  ;;  %v1603_v26 = vpack.c.bf16 %v1599_v22, %v1599_v22  ;;  %v5256_v23 = vld [vmem:[%s7387_s8 + $0x188] ss:$28 sps:$4 sm:$0xff]  }
 0x194   :  { %v1604_v25 = vpack.c.bf16 %v1600_v7, %v1600_v7 }
 0x196   :  { %2074 = vmatprep.mubr.bf16.mxu1 %v1604_v25  ;;  %v5264_v25 = vld [vmem:[%s7387_s8 + $0x154] ss:$28 sps:$4 sm:$0xff]  }
 0x197   :  { %2075 = vmatmul.mubr.bf16.vlgmr.msra.gmra.mxu1 %v1603_v26  ;;  %v5267_v26 = vld [vmem:[%s7387_s8 + $0x4d4] ss:$28 sps:$4 sm:$0xff]  }
 0x198   :  { %2345 = vmatpush1.bf16.msra.mxu1 %v5211_v51  ;;  %2376 = vmatprep.mubr.bf16.mxu1 %v5629_v13  ;;  %v5228_v13 = vld [vmem:[%s7385_s6 + $0x84] ss:$16 sps:$4 sm:$0xff]   ;;  %v5270_v51 = vld [vmem:[%s7387_s8 + $0x11c] ss:$28 sps:$4 sm:$0xff]  }
 0x199   :  { %2346 = vmatprep.subr.bf16.mxu1 %v5219_v30  ;;  %2309 = vmatprep.subr.bf16.mxu0 %v5228_v13  ;;  %v5271_v30 = vld [vmem:[%s7387_s8 + $0x498] ss:$28 sps:$4 sm:$0xff]   ;;  %v5280_v13 = vld [vmem:[%s7387_s8 + $0xa8] ss:$28 sps:$4 sm:$0xff]  }
 0x19a   :  { %2310 = vmatpush1.bf16.msra.mxu0 %v5226_v40  ;;  %v5288_v40 = vld [vmem:[%s7387_s8 + $0x74] ss:$28 sps:$4 sm:$0xff]  }
 0x19b   :  { %2311 = vmatprep.subr.bf16.mxu0 %v5234_v42  ;;  %v5286_v42 = vld [vmem:[%s7387_s8 + $0x70] ss:$28 sps:$4 sm:$0xff]  }
 0x19c   :  { %2347 = vmatpush1.bf16.msra.mxu1 %v5217_v31  ;;  %v5279_v31 = vld [vmem:[%s7387_s8 + $0x464] ss:$28 sps:$4 sm:$0xff]  }
 0x19d   :  { %2348 = vmatprep.subr.bf16.mxu1 %v5225_v35  ;;  %v5277_v35 = vld [vmem:[%s7387_s8 + $0x460] ss:$28 sps:$4 sm:$0xff]  }
 0x19e   :  { %2312 = vmatpush1.bf16.msra.mxu0 %v5232_v43  ;;  %v5289_v43 = vld [vmem:[%s7387_s8 + $0x3f0] ss:$28 sps:$4 sm:$0xff]  }
 0x19f   :  { %2313 = vmatprep.subr.bf16.mxu0 %v5240_v46  ;;  %v5292_v46 = vld [vmem:[%s7387_s8 + $0x38] ss:$28 sps:$4 sm:$0xff]  }
 0x1a0   :  { %2349 = vmatpush1.bf16.msra.mxu1 %v5223_v38  ;;  %v5285_v38 = vld [vmem:[%s7387_s8 + $0x42c] ss:$28 sps:$4 sm:$0xff]  }
 0x1a1   :  { %2350 = vmatprep.subr.bf16.mxu1 %v5231_v39  ;;  %v5283_v39 = vld [vmem:[%s7387_s8 + $0x428] ss:$28 sps:$4 sm:$0xff]  }
 0x1a2   :  { %2314 = vmatpush1.bf16.msra.mxu0 %v5238_v48  ;;  %v5300_v48 = vld [vmem:[%s7387_s8 + $0x4] ss:$28 sps:$4 sm:$0xff]  }
 0x1a3   :  { %2315 = vmatprep.subr.bf16.mxu0 %v5246_v50  ;;  %v5298_v50 = vld [vmem:[%s7387_s8] ss:$28 sps:$4 sm:$0xff]  }
 0x1a4   :  { %2351 = vmatpush1.bf16.msra.mxu1 %v5229_v41  ;;  %v5291_v41 = vld [vmem:[%s7387_s8 + $0x3f4] ss:$28 sps:$4 sm:$0xff]  }
 0x1a5   :  { %2352 = vmatprep.subr.bf16.mxu1 %v5237_v45  ;;  %v5297_v45 = vld [vmem:[%s7387_s8 + $0x3bc] ss:$28 sps:$4 sm:$0xff]  }
 0x1a6   :  { %2316 = vmatpush1.bf16.msra.mxu0 %v5244_v53  ;;  %v5306_v53 = vld [vmem:[%s7387_s8 + $0x34c] ss:$28 sps:$4 sm:$0xff]  }
 0x1a7   :  { %2317 = vmatprep.subr.bf16.mxu0 %v5252_v55  ;;  %v5304_v55 = vld [vmem:[%s7387_s8 + $0x348] ss:$28 sps:$4 sm:$0xff]  }
 0x1a8   :  { %2353 = vmatpush1.bf16.msra.mxu1 %v5235_v44  ;;  %v5294_v44 = vld [vmem:[%s7387_s8 + $0x3c] ss:$28 sps:$4 sm:$0xff]  }
 0x1a9   :  { %2354 = vmatprep.subr.bf16.mxu1 %v5243_v47  ;;  %v5295_v47 = vld [vmem:[%s7387_s8 + $0x3b8] ss:$28 sps:$4 sm:$0xff]  }
 0x1aa   :  { %2318 = vmatpush1.bf16.msra.mxu0 %v5250_v57  ;;  %v5312_v57 = vld [vmem:[%s7387_s8 + $0x314] ss:$28 sps:$4 sm:$0xff]  }
 0x1ab   :  { %3838 = vmatprep.subr.bf16.mxu0 %v5258_v59  ;;  %v5310_v59 = vld [vmem:[%s7387_s8 + $0x310] ss:$28 sps:$4 sm:$0xff]  }
 0x1ac   :  { %2355 = vmatpush1.bf16.msra.mxu1 %v5241_v49  ;;  %v5303_v49 = vld [vmem:[%s7387_s8 + $0x384] ss:$28 sps:$4 sm:$0xff]  }
 0x1ad   :  { %2356 = vmatprep.subr.bf16.mxu1 %v5249_v52  ;;  %v5301_v52 = vld [vmem:[%s7387_s8 + $0x380] ss:$28 sps:$4 sm:$0xff]  }
 0x1b0   :  { %2357 = vmatpush1.bf16.msra.mxu1 %v5247_v54  ;;  %v5309_v54 = vld [vmem:[%s7387_s8 + $0x6cc] ss:$28 sps:$4 sm:$0xff]  }
 0x1b1   :  { %2358 = vmatprep.subr.bf16.mxu1 %v5255_v56  ;;  %v5307_v56 = vld [vmem:[%s7387_s8 + $0x6c8] ss:$28 sps:$4 sm:$0xff]  }
 0x1b4   :  { %2359 = vmatpush1.bf16.msra.mxu1 %v5253_v58  ;;  %v5315_v58 = vld [vmem:[%s7387_s8 + $0x694] ss:$28 sps:$4 sm:$0xff]  }
 0x1b5   :  { %3879 = vmatprep.subr.bf16.mxu1 %v5261_v62  ;;  %v5313_v62 = vld [vmem:[%s7387_s8 + $0x690] ss:$28 sps:$4 sm:$0xff]  }
 0x20e   :  { %v2035_v63 = vpop.f32.mrf.mxu0 }
 0x20f   :  { %v2036_v8 = vadd.f32 %v2035_v63, %v1674_v4  ;;  %v5318_v63 = vld [vmem:[%s7387_s8 + $0x2dc] ss:$28 sps:$4 sm:$0xff]   ;;  %v5327_v4 = vld [vmem:[%s7387_s8 + $0x624] ss:$28 sps:$4 sm:$0xff]  }
 0x210   :  { %v2037_v0 = vpop.f32.mrf.mxu0 }
 0x211   :  { %v2038_v10 = vadd.f32 %v2037_v0, %v1678_v5  ;;  %v5321_v0 = vld [vmem:[%s7387_s8 + $0x65c] ss:$28 sps:$4 sm:$0xff]  }
 0x212   :  { %v2039_v1 = vpop.f32.mrf.mxu0  ;;  %v5322_v5 = vld [vmem:[%s7387_s8 + $0x2a0] ss:$28 sps:$4 sm:$0xff]  }
 0x213   :  { %v5316_v1 = vld [vmem:[%s7387_s8 + $0x2d8] ss:$28 sps:$4 sm:$0xff]  }
 0x214   :  { %v2040_v2 = vpop.f32.mrf.mxu0 }
 0x215   :  { %v5319_v2 = vld [vmem:[%s7387_s8 + $0x658] ss:$28 sps:$4 sm:$0xff]  }
 0x257   :  { %v2076_v9 = vpop.f32.mrf.mxu1 }
 0x258   :  { %v2077_v11 = vadd.f32 %v2076_v9, %v2036_v8  ;;  %v5325_v8 = vld [vmem:[%s7387_s8 + $0x620] ss:$28 sps:$4 sm:$0xff]   ;;  %v5330_v9 = vld [vmem:[%s7387_s8 + $0x26c] ss:$28 sps:$4 sm:$0xff]  }
 0x259   :  { %v2078_v12 = vpop.f32.mrf.mxu1 }
 0x25a   :  { %4213 = vst [vmem:[%s7390_s11] sm:$0xff] %v2077_v11  ;;  %v2079_v15 = vadd.f32 %v2078_v12, %v2038_v10  ;;  %v5333_v10 = vld [vmem:[%s7387_s8 + $0x5ec] ss:$28 sps:$4 sm:$0xff]  }
 0x25b   :  { %v2080_v16 = vpop.f32.mrf.mxu1  ;;  %v5331_v12 = vld [vmem:[%s7387_s8 + $0x5e8] ss:$28 sps:$4 sm:$0xff]  }
 0x25c   :  { %v2083_v17 = vmul.f32 1.442695, %v2079_v15  ;;  %4214 = vst [vmem:[%s7390_s11 + $0x8] sm:$0xff] %v2079_v15  ;;  %v5336_v15 = vld [vmem:[%s7387_s8 + $0x234] ss:$28 sps:$4 sm:$0xff]  }
 0x25d   :  { %v2081_v18 = vpop.f32.mrf.mxu1  ;;  %v5339_v16 = vld [vmem:[%s7387_s8 + $0x5b4] ss:$28 sps:$4 sm:$0xff]  }
 0x25e   :  { %5576 = vpow2.f32 %v2083_v17  ;;  %v5334_v17 = vld [vmem:[%s7387_s8 + $0x230] ss:$28 sps:$4 sm:$0xff]  }
 0x25f   :  { %v5337_v18 = vld [vmem:[%s7387_s8 + $0x5b0] ss:$28 sps:$4 sm:$0xff]  }
 0x26b   :  { %v5577_v20 = vpop.eup %5576 }
 0x26c   :  { %v2086_v21 = vmul.f32 %v5577_v20, %v2085_v19  ;;  %v5342_v19 = vld [vmem:[%s7387_s8 + $0x1fc] ss:$28 sps:$4 sm:$0xff]  }
 0x26d   :  { %v5345_v20 = vld [vmem:[%s7387_s8 + $0x57c] ss:$28 sps:$4 sm:$0xff]  }
 0x26e   :  { %v2087_v22 = vadd.f32 %v2086_v21, %v2077_v11  ;;  %v5328_v11 = vld [vmem:[%s7387_s8 + $0x268] ss:$28 sps:$4 sm:$0xff]   ;;  %v5340_v21 = vld [vmem:[%s7387_s8 + $0x1f8] ss:$28 sps:$4 sm:$0xff]  }
 0x270   :  { %v2088_v7 = vpack.c.bf16 %v2087_v22, %v2087_v22  ;;  %v5343_v22 = vld [vmem:[%s7387_s8 + $0x578] ss:$28 sps:$4 sm:$0xff]  }
 0x272   :  { %2336 = vmatmul.mubr.bf16.vlgmr.msra.gmra.mxu0 %v2088_v7  ;;  %2377 = vmatmul.mubr.bf16.vlgmr.msra.gmra.mxu1 %v2088_v7  ;;  %v5346_v7 = vld [vmem:[%s7387_s8 + $0x1c0] ss:$28 sps:$4 sm:$0xff]  }
 0x273   :  { %3839 = vmatpush1.bf16.msra.mxu0 %v5256_v23  ;;  %3880 = vmatpush1.bf16.msra.mxu1 %v5259_v24  ;;  %v5348_v23 = vld [vmem:[%s7387_s8 + $0x1c4] ss:$28 sps:$4 sm:$0xff]  }
 0x274   :  { %3840 = vmatprep.subr.bf16.mxu0 %v5264_v25  ;;  %3881 = vmatprep.subr.bf16.mxu1 %v5267_v26  ;;  %v5351_v24 = vld [vmem:[%s7387_s8 + $0x544] ss:$28 sps:$4 sm:$0xff]   ;;  %v5354_v26 = vld [vmem:[%s7387_s8 + $0x194] ss:$28 sps:$4 sm:$0xff]  }
 0x275   :  { %v5349_v25 = vld [vmem:[%s7387_s8 + $0x540] ss:$28 sps:$4 sm:$0xff]  }
 0x277   :  { %3841 = vmatpush1.bf16.msra.mxu0 %v5262_v27  ;;  %3882 = vmatpush1.bf16.msra.mxu1 %v5265_v14  ;;  %v5357_v27 = vld [vmem:[%s7387_s8 + $0x514] ss:$28 sps:$4 sm:$0xff]   ;;  %v2121_v14 = vld [vmem:[%s7386_s7] sm:$0xf] }
 0x278   :  { %3842 = vmatprep.subr.bf16.mxu0 %v5270_v51  ;;  %3883 = vmatprep.subr.bf16.mxu1 %v5273_v28  ;;  %v2126_v51 = vrot.slane %v2121_v14, %v6523_v34  ;;  %v2134_v28 = vrot.slane %v2121_v14, %v6535_v60 }
 0x27b   :  { %3843 = vmatpush1.bf16.msra.mxu0 %v5268_v29  ;;  %3884 = vmatpush1.bf16.msra.mxu1 %v5271_v30  ;;  %v2130_v29 = vrot.slane %v2121_v14, %v6529_v36  ;;  %v2138_v30 = vrot.slane %v2121_v14, %v6538_v61  ;;  %v5408_v14 = vld [vmem:[%s7387_s8 + $0x31c] ss:$28 sps:$4 sm:$0xff]  }
 0x27c   :  { %3844 = vmatprep.subr.bf16.mxu0 %v5276_v6  ;;  %3885 = vmatprep.subr.bf16.mxu1 %v5279_v31 }
 0x27f   :  { %3845 = vmatpush1.bf16.msra.mxu0 %v5274_v32  ;;  %3886 = vmatpush1.bf16.msra.mxu1 %v5277_v35 }
 0x280   :  { %3846 = vmatprep.subr.bf16.mxu0 %v5282_v37  ;;  %3887 = vmatprep.subr.bf16.mxu1 %v5285_v38 }
 0x283   :  { %3847 = vmatpush1.bf16.msra.mxu0 %v5280_v13  ;;  %3888 = vmatpush1.bf16.msra.mxu1 %v5283_v39 }
 0x284   :  { %3848 = vmatprep.subr.bf16.mxu0 %v5288_v40  ;;  %3889 = vmatprep.subr.bf16.mxu1 %v5291_v41 }
 0x287   :  { %3849 = vmatpush1.bf16.msra.mxu0 %v5286_v42  ;;  %3890 = vmatpush1.bf16.msra.mxu1 %v5289_v43 }
 0x288   :  { %3850 = vmatprep.subr.bf16.mxu0 %v5294_v44  ;;  %3891 = vmatprep.subr.bf16.mxu1 %v5297_v45 }
 0x28b   :  { %3851 = vmatpush1.bf16.msra.mxu0 %v5292_v46  ;;  %3892 = vmatpush1.bf16.msra.mxu1 %v5295_v47 }
 0x28c   :  { %3852 = vmatprep.subr.bf16.mxu0 %v5300_v48  ;;  %3893 = vmatprep.subr.bf16.mxu1 %v5303_v49 }
 0x28f   :  { %3853 = vmatpush1.bf16.msra.mxu0 %v5298_v50  ;;  %3894 = vmatpush1.bf16.msra.mxu1 %v5301_v52  ;;  %v5352_v50 = vld [vmem:[%s7387_s8 + $0x190] ss:$28 sps:$4 sm:$0xff]  }
 0x290   :  { %3854 = vmatprep.subr.bf16.mxu0 %v5306_v53  ;;  %3895 = vmatprep.subr.bf16.mxu1 %v5309_v54  ;;  %v5355_v52 = vld [vmem:[%s7387_s8 + $0x510] ss:$28 sps:$4 sm:$0xff]  }
 0x293   :  { %3855 = vmatpush2.bf16.msra.mxu0 %v5304_v55  ;;  %3896 = vmatpush2.bf16.msra.mxu1 %v5307_v56  ;;  %v5360_v55 = vld [vmem:[%s7387_s8 + $0x15c] ss:$28 sps:$4 sm:$0xff]  }
 0x294   :  { %3856 = vmatprep.subr.bf16.mxu0 %v5312_v57  ;;  %3897 = vmatprep.subr.bf16.mxu1 %v5315_v58  ;;  %v5363_v56 = vld [vmem:[%s7387_s8 + $0x4dc] ss:$28 sps:$4 sm:$0xff]  }
 0x295   :  { %v5358_v57 = vld [vmem:[%s7387_s8 + $0x158] ss:$28 sps:$4 sm:$0xff]  }
 0x296   :  { %v5361_v58 = vld [vmem:[%s7387_s8 + $0x4d8] ss:$28 sps:$4 sm:$0xff]  }
 0x297   :  { %3857 = vmatpush2.bf16.msra.mxu0 %v5310_v59  ;;  %3898 = vmatpush2.bf16.msra.mxu1 %v5313_v62  ;;  %v5366_v59 = vld [vmem:[%s7387_s8 + $0x124] ss:$28 sps:$4 sm:$0xff]  }
 0x298   :  { %3858 = vmatprep.subr.bf16.mxu0 %v5318_v63  ;;  %3899 = vmatprep.subr.bf16.mxu1 %v5321_v0  ;;  %v5369_v62 = vld [vmem:[%s7387_s8 + $0x4a4] ss:$28 sps:$4 sm:$0xff]  }
 0x299   :  { %v5364_v63 = vld [vmem:[%s7387_s8 + $0x120] ss:$28 sps:$4 sm:$0xff]  }
 0x29a   :  { %v5367_v0 = vld [vmem:[%s7387_s8 + $0x4a0] ss:$28 sps:$4 sm:$0xff]  }
 0x29b   :  { %3859 = vmatpush2.bf16.msra.mxu0 %v5316_v1  ;;  %3900 = vmatpush2.bf16.msra.mxu1 %v5319_v2  ;;  %v5372_v1 = vld [vmem:[%s7387_s8 + $0xec] ss:$28 sps:$4 sm:$0xff]  }
 0x29c   :  { %3860 = vmatprep.subr.bf16.mxu0 %v5324_v3  ;;  %3901 = vmatprep.subr.bf16.mxu1 %v5327_v4  ;;  %v5375_v2 = vld [vmem:[%s7387_s8 + $0x46c] ss:$28 sps:$4 sm:$0xff]  }
 0x29d   :  { %v5370_v3 = vld [vmem:[%s7387_s8 + $0xe8] ss:$28 sps:$4 sm:$0xff]  }
 0x29e   :  { %v5373_v4 = vld [vmem:[%s7387_s8 + $0x468] ss:$28 sps:$4 sm:$0xff]  }
 0x29f   :  { %3861 = vmatpush2.bf16.msra.mxu0 %v5322_v5  ;;  %3902 = vmatpush2.bf16.msra.mxu1 %v5325_v8  ;;  %v5378_v5 = vld [vmem:[%s7387_s8 + $0xb4] ss:$28 sps:$4 sm:$0xff]  }
 0x2a0   :  { %3862 = vmatprep.subr.bf16.mxu0 %v5330_v9  ;;  %3903 = vmatprep.subr.bf16.mxu1 %v5333_v10  ;;  %v5381_v8 = vld [vmem:[%s7387_s8 + $0x434] ss:$28 sps:$4 sm:$0xff]  }
 0x2a1   :  { %v5376_v9 = vld [vmem:[%s7387_s8 + $0xb0] ss:$28 sps:$4 sm:$0xff]  }
 0x2a2   :  { %v5379_v10 = vld [vmem:[%s7387_s8 + $0x430] ss:$28 sps:$4 sm:$0xff]  }
 0x2a3   :  { %3863 = vmatpush2.bf16.msra.mxu0 %v5328_v11  ;;  %3904 = vmatpush2.bf16.msra.mxu1 %v5331_v12  ;;  %v5384_v11 = vld [vmem:[%s7387_s8 + $0x7c] ss:$28 sps:$4 sm:$0xff]  }
 0x2a4   :  { %3864 = vmatprep.subr.bf16.mxu0 %v5336_v15  ;;  %3905 = vmatprep.subr.bf16.mxu1 %v5339_v16  ;;  %v5387_v12 = vld [vmem:[%s7387_s8 + $0x3fc] ss:$28 sps:$4 sm:$0xff]  }
 0x2a5   :  { %v5382_v15 = vld [vmem:[%s7387_s8 + $0x78] ss:$28 sps:$4 sm:$0xff]  }
 0x2a6   :  { %v5385_v16 = vld [vmem:[%s7387_s8 + $0x3f8] ss:$28 sps:$4 sm:$0xff]  }
 0x2a7   :  { %3865 = vmatpush2.bf16.msra.mxu0 %v5334_v17  ;;  %3906 = vmatpush2.bf16.msra.mxu1 %v5337_v18  ;;  %v5390_v17 = vld [vmem:[%s7387_s8 + $0x44] ss:$28 sps:$4 sm:$0xff]  }
 0x2a8   :  { %3866 = vmatprep.subr.bf16.mxu0 %v5342_v19  ;;  %3907 = vmatprep.subr.bf16.mxu1 %v5345_v20  ;;  %v5393_v18 = vld [vmem:[%s7387_s8 + $0x3c4] ss:$28 sps:$4 sm:$0xff]  }
 0x2a9   :  { %v5388_v19 = vld [vmem:[%s7387_s8 + $0x40] ss:$28 sps:$4 sm:$0xff]  }
 0x2aa   :  { %v5391_v20 = vld [vmem:[%s7387_s8 + $0x3c0] ss:$28 sps:$4 sm:$0xff]  }
 0x2ab   :  { %3867 = vmatpush2.bf16.msra.mxu0 %v5340_v21  ;;  %3908 = vmatpush2.bf16.msra.mxu1 %v5343_v22  ;;  %v5396_v21 = vld [vmem:[%s7387_s8 + $0xc] ss:$28 sps:$4 sm:$0xff]  }
 0x2ac   :  { %3868 = vmatprep.subr.bf16.mxu0 %v5348_v23  ;;  %3909 = vmatprep.subr.bf16.mxu1 %v5351_v24  ;;  %v5399_v22 = vld [vmem:[%s7387_s8 + $0x38c] ss:$28 sps:$4 sm:$0xff]  }
 0x2ad   :  { %v5394_v23 = vld [vmem:[%s7387_s8 + $0x8] ss:$28 sps:$4 sm:$0xff]  }
 0x2ae   :  { %v5397_v24 = vld [vmem:[%s7387_s8 + $0x388] ss:$28 sps:$4 sm:$0xff]  }
 0x2af   :  { %3869 = vmatpush2.bf16.msra.mxu0 %v5346_v7  ;;  %3910 = vmatpush2.bf16.msra.mxu1 %v5349_v25  ;;  %v5402_v7 = vld [vmem:[%s7387_s8 + $0x354] ss:$28 sps:$4 sm:$0xff]  }
 0x2b0   :  { %3920 = vmatprep.subr.bf16.mxu0 %v5354_v26  ;;  %3961 = vmatprep.subr.bf16.mxu1 %v5357_v27  ;;  %v5405_v25 = vld [vmem:[%s7387_s8 + $0x6d4] ss:$28 sps:$4 sm:$0xff]  }
 0x2b1   :  { %v5400_v26 = vld [vmem:[%s7387_s8 + $0x350] ss:$28 sps:$4 sm:$0xff]  }
 0x2b2   :  { %v5403_v27 = vld [vmem:[%s7387_s8 + $0x6d0] ss:$28 sps:$4 sm:$0xff]  }
 0x332   :  { %v2337_v6 = vpop.f32.mrf.mxu0  ;;  %v2378_v31 = vpop.f32.mrf.mxu1 }
 0x333   :  { %v2338_v32 = vadd.f32 %v2337_v6, %v2126_v51  ;;  %v2379_v35 = vadd.f32 %v2378_v31, %v2134_v28  ;;  %v5411_v51 = vld [vmem:[%s7387_s8 + $0x69c] ss:$28 sps:$4 sm:$0xff]   ;;  %v5417_v6 = vld [vmem:[%s7387_s8 + $0x664] ss:$28 sps:$4 sm:$0xff]  }
 0x334   :  { %v2339_v37 = vpop.f32.mrf.mxu0  ;;  %v2380_v38 = vpop.f32.mrf.mxu1  ;;  %v5406_v28 = vld [vmem:[%s7387_s8 + $0x318] ss:$28 sps:$4 sm:$0xff]   ;;  %v5412_v31 = vld [vmem:[%s7387_s8 + $0x2e0] ss:$28 sps:$4 sm:$0xff]  }
 0x335   :  { %v2340_v13 = vadd.f32 %v2339_v37, %v2130_v29  ;;  %v2381_v39 = vadd.f32 %v2380_v38, %v2138_v30  ;;  %v2385_v40 = vmax.f32 %v2338_v32, 0.0  ;;  %v2387_v41 = vmax.f32 %v2379_v35, 0.0  ;;  %v5409_v29 = vld [vmem:[%s7387_s8 + $0x698] ss:$28 sps:$4 sm:$0xff]   ;;  %v5414_v30 = vld [vmem:[%s7387_s8 + $0x2e4] ss:$28 sps:$4 sm:$0xff]  }
 0x336   :  { %v2341_v42 = vpop.f32.mrf.mxu0  ;;  %v2382_v43 = vpop.f32.mrf.mxu1  ;;  %v5415_v32 = vld [vmem:[%s7387_s8 + $0x660] ss:$28 sps:$4 sm:$0xff]   ;;  %v5420_v35 = vld [vmem:[%s7387_s8 + $0x2ac] ss:$28 sps:$4 sm:$0xff]  }
 0x337   :  { %v2386_v44 = vmax.f32 %v2340_v13, 0.0  ;;  %v2388_v45 = vmax.f32 %v2381_v39, 0.0  ;;  %v6868_v53 = vpack.c.bf16 %v2385_v40, %v2385_v40  ;;  %v6870_v54 = vpack.c.bf16 %v2387_v41, %v2387_v41  ;;  %v5423_v37 = vld [vmem:[%s7387_s8 + $0x62c] ss:$28 sps:$4 sm:$0xff]   ;;  %v5426_v39 = vld [vmem:[%s7387_s8 + $0x274] ss:$28 sps:$4 sm:$0xff]  }
 0x338   :  { %v2342_v46 = vpop.f32.mrf.mxu0  ;;  %v2383_v47 = vpop.f32.mrf.mxu1  ;;  %v5418_v38 = vld [vmem:[%s7387_s8 + $0x2a8] ss:$28 sps:$4 sm:$0xff]   ;;  %v5429_v40 = vld [vmem:[%s7387_s8 + $0x5f4] ss:$28 sps:$4 sm:$0xff]   ;;  %v5432_v43 = vld [vmem:[%s7387_s8 + $0x23c] ss:$28 sps:$4 sm:$0xff]  }
 0x339   :  { %v6858_v48 = vpack.c.bf16 %v2386_v44, %v2386_v44  ;;  %v6860_v49 = vpack.c.bf16 %v2388_v45, %v2388_v45  ;;  %v5421_v13 = vld [vmem:[%s7387_s8 + $0x628] ss:$28 sps:$4 sm:$0xff]   ;;  %v5424_v41 = vld [vmem:[%s7387_s8 + $0x270] ss:$28 sps:$4 sm:$0xff]   ;;  %v5435_v44 = vld [vmem:[%s7387_s8 + $0x5bc] ss:$28 sps:$4 sm:$0xff]  }
 0x33a   :  { %v5427_v42 = vld [vmem:[%s7387_s8 + $0x5f0] ss:$28 sps:$4 sm:$0xff]   ;;  %v5430_v45 = vld [vmem:[%s7387_s8 + $0x238] ss:$28 sps:$4 sm:$0xff]   ;;  %v5438_v47 = vld [vmem:[%s7387_s8 + $0x204] ss:$28 sps:$4 sm:$0xff]  }
 0x33b   :  { %3870 = vmatprep.mubr.bf16.mxu0 %v6858_v48  ;;  %3911 = vmatprep.mubr.bf16.mxu1 %v6860_v49  ;;  %v5433_v46 = vld [vmem:[%s7387_s8 + $0x5b8] ss:$28 sps:$4 sm:$0xff]  }
 0x33c   :  { %3871 = vmatmul.mubr.bf16.vlgmr.msra.gmra.mxu0 %v6868_v53  ;;  %3912 = vmatmul.mubr.bf16.vlgmr.msra.gmra.mxu1 %v6870_v54 }
 0x33d   :  { %3921 = vmatpush1.bf16.msra.mxu0 %v5352_v50  ;;  %3962 = vmatpush1.bf16.msra.mxu1 %v5355_v52  ;;  %v5441_v50 = vld [vmem:[%s7387_s8 + $0x584] ss:$28 sps:$4 sm:$0xff]  }
 0x33e   :  { %3952 = vmatprep.mubr.bf16.mxu0 %v6858_v48  ;;  %3993 = vmatprep.mubr.bf16.mxu1 %v6860_v49  ;;  %v5436_v52 = vld [vmem:[%s7387_s8 + $0x200] ss:$28 sps:$4 sm:$0xff]  }
 0x33f   :  { %3922 = vmatprep.subr.bf16.mxu0 %v5360_v55  ;;  %3963 = vmatprep.subr.bf16.mxu1 %v5363_v56  ;;  %v5439_v55 = vld [vmem:[%s7387_s8 + $0x580] ss:$28 sps:$4 sm:$0xff]   ;;  %v5444_v56 = vld [vmem:[%s7387_s8 + $0x1cc] ss:$28 sps:$4 sm:$0xff]  }
 0x341   :  { %3923 = vmatpush1.bf16.msra.mxu0 %v5358_v57  ;;  %3964 = vmatpush1.bf16.msra.mxu1 %v5361_v58  ;;  %v5447_v57 = vld [vmem:[%s7387_s8 + $0x54c] ss:$28 sps:$4 sm:$0xff]  }
 0x342   :  { %3924 = vmatprep.subr.bf16.mxu0 %v5366_v59  ;;  %3965 = vmatprep.subr.bf16.mxu1 %v5369_v62  ;;  %v5442_v58 = vld [vmem:[%s7387_s8 + $0x1c8] ss:$28 sps:$4 sm:$0xff]   ;;  %v5450_v62 = vld [vmem:[%s7387_s8 + $0x19c] ss:$28 sps:$4 sm:$0xff]  }
 0x343   :  { %v5445_v59 = vld [vmem:[%s7387_s8 + $0x548] ss:$28 sps:$4 sm:$0xff]  }
 0x345   :  { %3925 = vmatpush1.bf16.msra.mxu0 %v5364_v63  ;;  %3966 = vmatpush1.bf16.msra.mxu1 %v5367_v0  ;;  %v5453_v63 = vld [vmem:[%s7387_s8 + $0x51c] ss:$28 sps:$4 sm:$0xff]  }
 0x346   :  { %3926 = vmatprep.subr.bf16.mxu0 %v5372_v1  ;;  %3967 = vmatprep.subr.bf16.mxu1 %v5375_v2  ;;  %v5448_v0 = vld [vmem:[%s7387_s8 + $0x198] ss:$28 sps:$4 sm:$0xff]   ;;  %v5456_v2 = vld [vmem:[%s7387_s8 + $0x164] ss:$28 sps:$4 sm:$0xff]  }
 0x347   :  { %v5451_v1 = vld [vmem:[%s7387_s8 + $0x518] ss:$28 sps:$4 sm:$0xff]  }
 0x349   :  { %3927 = vmatpush1.bf16.msra.mxu0 %v5370_v3  ;;  %3968 = vmatpush1.bf16.msra.mxu1 %v5373_v4  ;;  %v5459_v3 = vld [vmem:[%s7387_s8 + $0x4e4] ss:$28 sps:$4 sm:$0xff]  }
 0x34a   :  { %3928 = vmatprep.subr.bf16.mxu0 %v5378_v5  ;;  %3969 = vmatprep.subr.bf16.mxu1 %v5381_v8  ;;  %v5454_v4 = vld [vmem:[%s7387_s8 + $0x160] ss:$28 sps:$4 sm:$0xff]   ;;  %v5462_v8 = vld [vmem:[%s7387_s8 + $0x12c] ss:$28 sps:$4 sm:$0xff]  }
 0x34b   :  { %v5457_v5 = vld [vmem:[%s7387_s8 + $0x4e0] ss:$28 sps:$4 sm:$0xff]  }
 0x34d   :  { %3929 = vmatpush1.bf16.msra.mxu0 %v5376_v9  ;;  %3970 = vmatpush1.bf16.msra.mxu1 %v5379_v10  ;;  %v5465_v9 = vld [vmem:[%s7387_s8 + $0x4ac] ss:$28 sps:$4 sm:$0xff]  }
 0x34e   :  { %3930 = vmatprep.subr.bf16.mxu0 %v5384_v11  ;;  %3971 = vmatprep.subr.bf16.mxu1 %v5387_v12  ;;  %v5460_v10 = vld [vmem:[%s7387_s8 + $0x128] ss:$28 sps:$4 sm:$0xff]   ;;  %v5468_v12 = vld [vmem:[%s7387_s8 + $0xf4] ss:$28 sps:$4 sm:$0xff]  }
 0x34f   :  { %v5463_v11 = vld [vmem:[%s7387_s8 + $0x4a8] ss:$28 sps:$4 sm:$0xff]  }
 0x351   :  { %3931 = vmatpush1.bf16.msra.mxu0 %v5382_v15  ;;  %3972 = vmatpush1.bf16.msra.mxu1 %v5385_v16  ;;  %v5471_v15 = vld [vmem:[%s7387_s8 + $0x474] ss:$28 sps:$4 sm:$0xff]  }
 0x352   :  { %3932 = vmatprep.subr.bf16.mxu0 %v5390_v17  ;;  %3973 = vmatprep.subr.bf16.mxu1 %v5393_v18  ;;  %v5466_v16 = vld [vmem:[%s7387_s8 + $0xf0] ss:$28 sps:$4 sm:$0xff]   ;;  %v5474_v18 = vld [vmem:[%s7387_s8 + $0xbc] ss:$28 sps:$4 sm:$0xff]  }
 0x353   :  { %v5469_v17 = vld [vmem:[%s7387_s8 + $0x470] ss:$28 sps:$4 sm:$0xff]  }
 0x355   :  { %3933 = vmatpush1.bf16.msra.mxu0 %v5388_v19  ;;  %3974 = vmatpush1.bf16.msra.mxu1 %v5391_v20  ;;  %v5477_v19 = vld [vmem:[%s7387_s8 + $0x43c] ss:$28 sps:$4 sm:$0xff]  }
 0x356   :  { %3934 = vmatprep.subr.bf16.mxu0 %v5396_v21  ;;  %3975 = vmatprep.subr.bf16.mxu1 %v5399_v22  ;;  %v5472_v20 = vld [vmem:[%s7387_s8 + $0xb8] ss:$28 sps:$4 sm:$0xff]   ;;  %v5480_v22 = vld [vmem:[%s7387_s8 + $0x84] ss:$28 sps:$4 sm:$0xff]  }
 0x357   :  { %v5475_v21 = vld [vmem:[%s7387_s8 + $0x438] ss:$28 sps:$4 sm:$0xff]  }
 0x359   :  { %3935 = vmatpush1.bf16.msra.mxu0 %v5394_v23  ;;  %3976 = vmatpush1.bf16.msra.mxu1 %v5397_v24  ;;  %v5483_v23 = vld [vmem:[%s7387_s8 + $0x404] ss:$28 sps:$4 sm:$0xff]  }
 0x35a   :  { %3936 = vmatprep.subr.bf16.mxu0 %v5402_v7  ;;  %3977 = vmatprep.subr.bf16.mxu1 %v5405_v25  ;;  %v5478_v24 = vld [vmem:[%s7387_s8 + $0x80] ss:$28 sps:$4 sm:$0xff]   ;;  %v5486_v25 = vld [vmem:[%s7387_s8 + $0x4c] ss:$28 sps:$4 sm:$0xff]  }
 0x35b   :  { %v5481_v7 = vld [vmem:[%s7387_s8 + $0x400] ss:$28 sps:$4 sm:$0xff]  }
 0x35d   :  { %3937 = vmatpush2.bf16.msra.mxu0 %v5400_v26  ;;  %3978 = vmatpush2.bf16.msra.mxu1 %v5403_v27  ;;  %v5489_v26 = vld [vmem:[%s7387_s8 + $0x3cc] ss:$28 sps:$4 sm:$0xff]  }
 0x35e   :  { %3938 = vmatprep.subr.bf16.mxu0 %v5408_v14  ;;  %3979 = vmatprep.subr.bf16.mxu1 %v5411_v51  ;;  %v5484_v27 = vld [vmem:[%s7387_s8 + $0x48] ss:$28 sps:$4 sm:$0xff]   ;;  %v5492_v51 = vld [vmem:[%s7387_s8 + $0x14] ss:$28 sps:$4 sm:$0xff]  }
 0x35f   :  { %v5487_v14 = vld [vmem:[%s7387_s8 + $0x3c8] ss:$28 sps:$4 sm:$0xff]  }
 0x361   :  { %3939 = vmatpush2.bf16.msra.mxu0 %v5406_v28  ;;  %3980 = vmatpush2.bf16.msra.mxu1 %v5409_v29  ;;  %v5495_v28 = vld [vmem:[%s7387_s8 + $0x394] ss:$28 sps:$4 sm:$0xff]  }
 0x362   :  { %3940 = vmatprep.subr.bf16.mxu0 %v5414_v30  ;;  %3981 = vmatprep.subr.bf16.mxu1 %v5417_v6  ;;  %v5490_v29 = vld [vmem:[%s7387_s8 + $0x10] ss:$28 sps:$4 sm:$0xff]   ;;  %v5498_v6 = vld [vmem:[%s7387_s8 + $0x35c] ss:$28 sps:$4 sm:$0xff]  }
 0x363   :  { %v5493_v30 = vld [vmem:[%s7387_s8 + $0x390] ss:$28 sps:$4 sm:$0xff]  }
 0x365   :  { %3941 = vmatpush2.bf16.msra.mxu0 %v5412_v31  ;;  %3982 = vmatpush2.bf16.msra.mxu1 %v5415_v32  ;;  %v5501_v31 = vld [vmem:[%s7387_s8 + $0x6dc] ss:$28 sps:$4 sm:$0xff]  }
 0x366   :  { %3942 = vmatprep.subr.bf16.mxu0 %v5420_v35  ;;  %3983 = vmatprep.subr.bf16.mxu1 %v5423_v37  ;;  %v5496_v32 = vld [vmem:[%s7387_s8 + $0x358] ss:$28 sps:$4 sm:$0xff]   ;;  %v5504_v37 = vld [vmem:[%s7387_s8 + $0x324] ss:$28 sps:$4 sm:$0xff]  }
 0x367   :  { %v5499_v35 = vld [vmem:[%s7387_s8 + $0x6d8] ss:$28 sps:$4 sm:$0xff]  }
 0x369   :  { %3943 = vmatpush2.bf16.msra.mxu0 %v5418_v38  ;;  %3984 = vmatpush2.bf16.msra.mxu1 %v5421_v13  ;;  %v5507_v38 = vld [vmem:[%s7387_s8 + $0x6a4] ss:$28 sps:$4 sm:$0xff]  }
 0x36a   :  { %3944 = vmatprep.subr.bf16.mxu0 %v5426_v39  ;;  %3985 = vmatprep.subr.bf16.mxu1 %v5429_v40  ;;  %v5502_v13 = vld [vmem:[%s7387_s8 + $0x320] ss:$28 sps:$4 sm:$0xff]   ;;  %v5510_v40 = vld [vmem:[%s7387_s8 + $0x2ec] ss:$28 sps:$4 sm:$0xff]  }
 0x36b   :  { %v5505_v39 = vld [vmem:[%s7387_s8 + $0x6a0] ss:$28 sps:$4 sm:$0xff]  }
 0x36d   :  { %3945 = vmatpush2.bf16.msra.mxu0 %v5424_v41  ;;  %3986 = vmatpush2.bf16.msra.mxu1 %v5427_v42  ;;  %v5513_v41 = vld [vmem:[%s7387_s8 + $0x66c] ss:$28 sps:$4 sm:$0xff]  }
 0x36e   :  { %3946 = vmatprep.subr.bf16.mxu0 %v5432_v43  ;;  %3987 = vmatprep.subr.bf16.mxu1 %v5435_v44  ;;  %v5508_v42 = vld [vmem:[%s7387_s8 + $0x2e8] ss:$28 sps:$4 sm:$0xff]   ;;  %v5516_v44 = vld [vmem:[%s7387_s8 + $0x2b4] ss:$28 sps:$4 sm:$0xff]  }
 0x36f   :  { %v5511_v43 = vld [vmem:[%s7387_s8 + $0x668] ss:$28 sps:$4 sm:$0xff]  }
 0x371   :  { %3947 = vmatpush2.bf16.msra.mxu0 %v5430_v45  ;;  %3988 = vmatpush2.bf16.msra.mxu1 %v5433_v46  ;;  %v5519_v45 = vld [vmem:[%s7387_s8 + $0x634] ss:$28 sps:$4 sm:$0xff]  }
 0x372   :  { %3948 = vmatprep.subr.bf16.mxu0 %v5438_v47  ;;  %3989 = vmatprep.subr.bf16.mxu1 %v5441_v50  ;;  %v5514_v46 = vld [vmem:[%s7387_s8 + $0x2b0] ss:$28 sps:$4 sm:$0xff]   ;;  %v5522_v50 = vld [vmem:[%s7387_s8 + $0x27c] ss:$28 sps:$4 sm:$0xff]  }
 0x373   :  { %v5517_v47 = vld [vmem:[%s7387_s8 + $0x630] ss:$28 sps:$4 sm:$0xff]  }
 0x375   :  { %3949 = vmatpush2.bf16.msra.mxu0 %v5436_v52  ;;  %3990 = vmatpush2.bf16.msra.mxu1 %v5439_v55  ;;  %v5525_v52 = vld [vmem:[%s7387_s8 + $0x5fc] ss:$28 sps:$4 sm:$0xff]  }
 0x376   :  { %3950 = vmatprep.subr.bf16.mxu0 %v5444_v56  ;;  %3991 = vmatprep.subr.bf16.mxu1 %v5447_v57  ;;  %v5520_v55 = vld [vmem:[%s7387_s8 + $0x278] ss:$28 sps:$4 sm:$0xff]   ;;  %v5528_v57 = vld [vmem:[%s7387_s8 + $0x244] ss:$28 sps:$4 sm:$0xff]  }
 0x377   :  { %v5523_v56 = vld [vmem:[%s7387_s8 + $0x5f8] ss:$28 sps:$4 sm:$0xff]  }
 0x379   :  { %3951 = vmatpush2.bf16.msra.mxu0 %v5442_v58  ;;  %3992 = vmatpush2.bf16.msra.mxu1 %v5445_v59  ;;  %v5531_v58 = vld [vmem:[%s7387_s8 + $0x5c4] ss:$28 sps:$4 sm:$0xff]  }
 0x37a   :  { %4002 = vmatprep.subr.bf16.mxu0 %v5450_v62  ;;  %4043 = vmatprep.subr.bf16.mxu1 %v5453_v63  ;;  %v5526_v59 = vld [vmem:[%s7387_s8 + $0x240] ss:$28 sps:$4 sm:$0xff]   ;;  %v5534_v63 = vld [vmem:[%s7387_s8 + $0x20c] ss:$28 sps:$4 sm:$0xff]  }
 0x37b   :  { %v5529_v62 = vld [vmem:[%s7387_s8 + $0x5c0] ss:$28 sps:$4 sm:$0xff]  }
 0x37c   :  { %3953 = vmatmul.mubr.bf16.vlgmr.msra.gmra.mxu0 %v6868_v53  ;;  %3994 = vmatmul.mubr.bf16.vlgmr.msra.gmra.mxu1 %v6870_v54 }
 0x37d   :  { %4003 = vmatpush1.bf16.msra.mxu0 %v5448_v0  ;;  %4034 = vmatprep.mubr.bf16.mxu0 %v6858_v48  ;;  %v5537_v0 = vld [vmem:[%s7387_s8 + $0x58c] ss:$28 sps:$4 sm:$0xff]  }
 0x37e   :  { %4044 = vmatpush1.bf16.msra.mxu1 %v5451_v1  ;;  %4075 = vmatprep.mubr.bf16.mxu1 %v6860_v49  ;;  %v5532_v1 = vld [vmem:[%s7387_s8 + $0x208] ss:$28 sps:$4 sm:$0xff]  }
 0x37f   :  { %4004 = vmatprep.subr.bf16.mxu0 %v5456_v2  ;;  %4045 = vmatprep.subr.bf16.mxu1 %v5459_v3  ;;  %v5535_v2 = vld [vmem:[%s7387_s8 + $0x588] ss:$28 sps:$4 sm:$0xff]   ;;  %v5540_v3 = vld [vmem:[%s7387_s8 + $0x1d4] ss:$28 sps:$4 sm:$0xff]  }
 0x381   :  { %4005 = vmatpush1.bf16.msra.mxu0 %v5454_v4  ;;  %v5543_v4 = vld [vmem:[%s7387_s8 + $0x554] ss:$28 sps:$4 sm:$0xff]  }
 0x382   :  { %4046 = vmatpush1.bf16.msra.mxu1 %v5457_v5  ;;  %4006 = vmatprep.subr.bf16.mxu0 %v5462_v8  ;;  %v5538_v5 = vld [vmem:[%s7387_s8 + $0x1d0] ss:$28 sps:$4 sm:$0xff]  }
 0x383   :  { %4047 = vmatprep.subr.bf16.mxu1 %v5465_v9  ;;  %v5541_v8 = vld [vmem:[%s7387_s8 + $0x550] ss:$28 sps:$4 sm:$0xff]   ;;  %v5544_v9 = vld [vmem:[%s7387_s8 + $0x360] ss:$28 sps:$4 sm:$0xff]  }
 0x385   :  { %4007 = vmatpush1.bf16.msra.mxu0 %v5460_v10  ;;  %v5545_v10 = vld [vmem:[%s7387_s8 + $0x6e0] ss:$28 sps:$4 sm:$0xff]  }
 0x386   :  { %4048 = vmatpush1.bf16.msra.mxu1 %v5463_v11  ;;  %4008 = vmatprep.subr.bf16.mxu0 %v5468_v12  ;;  %v5546_v11 = vld [vmem:[%s7387_s8 + $0x1a0] ss:$28 sps:$4 sm:$0xff]  }
 0x387   :  { %4049 = vmatprep.subr.bf16.mxu1 %v5471_v15  ;;  %v5547_v12 = vld [vmem:[%s7387_s8 + $0x520] ss:$28 sps:$4 sm:$0xff]   ;;  %v5548_v15 = vld [vmem:[%s7387_s8 + $0x328] ss:$28 sps:$4 sm:$0xff]  }
 0x389   :  { %4009 = vmatpush1.bf16.msra.mxu0 %v5466_v16  ;;  %v5549_v16 = vld [vmem:[%s7387_s8 + $0x6a8] ss:$28 sps:$4 sm:$0xff]  }
 0x38a   :  { %4050 = vmatpush1.bf16.msra.mxu1 %v5469_v17  ;;  %4010 = vmatprep.subr.bf16.mxu0 %v5474_v18  ;;  %v5550_v17 = vld [vmem:[%s7387_s8 + $0x168] ss:$28 sps:$4 sm:$0xff]  }
 0x38b   :  { %4051 = vmatprep.subr.bf16.mxu1 %v5477_v19  ;;  %v5551_v18 = vld [vmem:[%s7387_s8 + $0x4e8] ss:$28 sps:$4 sm:$0xff]   ;;  %v5552_v19 = vld [vmem:[%s7387_s8 + $0x2f0] ss:$28 sps:$4 sm:$0xff]  }
 0x38d   :  { %4011 = vmatpush1.bf16.msra.mxu0 %v5472_v20  ;;  %v5553_v20 = vld [vmem:[%s7387_s8 + $0x670] ss:$28 sps:$4 sm:$0xff]  }
 0x38e   :  { %4052 = vmatpush1.bf16.msra.mxu1 %v5475_v21  ;;  %4012 = vmatprep.subr.bf16.mxu0 %v5480_v22  ;;  %v5555_v21 = vld [vmem:[%s7387_s8 + $0x4b0] ss:$28 sps:$4 sm:$0xff]   ;;  %v5557_v22 = vld [vmem:[%s7387_s8 + $0x638] ss:$28 sps:$4 sm:$0xff]  }
 0x38f   :  { %4053 = vmatprep.subr.bf16.mxu1 %v5483_v23  ;;  %v5558_v23 = vld [vmem:[%s7387_s8 + $0xf8] ss:$28 sps:$4 sm:$0xff]  }
 0x391   :  { %4013 = vmatpush1.bf16.msra.mxu0 %v5478_v24  ;;  %v5559_v24 = vld [vmem:[%s7387_s8 + $0x478] ss:$28 sps:$4 sm:$0xff]  }
 0x392   :  { %4054 = vmatpush1.bf16.msra.mxu1 %v5481_v7  ;;  %4014 = vmatprep.subr.bf16.mxu0 %v5486_v25  ;;  %v5560_v7 = vld [vmem:[%s7387_s8 + $0x280] ss:$28 sps:$4 sm:$0xff]  }
 0x393   :  { %4055 = vmatprep.subr.bf16.mxu1 %v5489_v26  ;;  %v5561_v25 = vld [vmem:[%s7387_s8 + $0x600] ss:$28 sps:$4 sm:$0xff]  }
 0x394   :  { %v5562_v26 = vld [vmem:[%s7387_s8 + $0xc0] ss:$28 sps:$4 sm:$0xff]  }
 0x395   :  { %4015 = vmatpush1.bf16.msra.mxu0 %v5484_v27  ;;  %v5563_v27 = vld [vmem:[%s7387_s8 + $0x440] ss:$28 sps:$4 sm:$0xff]  }
 0x396   :  { %4056 = vmatpush1.bf16.msra.mxu1 %v5487_v14  ;;  %4016 = vmatprep.subr.bf16.mxu0 %v5492_v51  ;;  %v5564_v14 = vld [vmem:[%s7387_s8 + $0x248] ss:$28 sps:$4 sm:$0xff]  }
 0x397   :  { %4057 = vmatprep.subr.bf16.mxu1 %v5495_v28  ;;  %v5565_v51 = vld [vmem:[%s7387_s8 + $0x5c8] ss:$28 sps:$4 sm:$0xff]  }
 0x398   :  { %v5566_v28 = vld [vmem:[%s7387_s8 + $0x88] ss:$28 sps:$4 sm:$0xff]  }
 0x399   :  { %4017 = vmatpush1.bf16.msra.mxu0 %v5490_v29  ;;  %v5567_v29 = vld [vmem:[%s7387_s8 + $0x408] ss:$28 sps:$4 sm:$0xff]  }
 0x39a   :  { %4058 = vmatpush1.bf16.msra.mxu1 %v5493_v30  ;;  %4018 = vmatprep.subr.bf16.mxu0 %v5498_v6  ;;  %v5568_v30 = vld [vmem:[%s7387_s8 + $0x210] ss:$28 sps:$4 sm:$0xff]  }
 0x39b   :  { %4059 = vmatprep.subr.bf16.mxu1 %v5501_v31  ;;  %v5569_v6 = vld [vmem:[%s7387_s8 + $0x590] ss:$28 sps:$4 sm:$0xff]  }
 0x39c   :  { %v5570_v31 = vld [vmem:[%s7387_s8 + $0x50] ss:$28 sps:$4 sm:$0xff]  }
 0x39d   :  { %4019 = vmatpush2.bf16.msra.mxu0 %v5496_v32  ;;  %v5571_v32 = vld [vmem:[%s7387_s8 + $0x3d0] ss:$28 sps:$4 sm:$0xff]  }
 0x39e   :  { %4060 = vmatpush2.bf16.msra.mxu1 %v5499_v35  ;;  %4020 = vmatprep.subr.bf16.mxu0 %v5504_v37  ;;  %v5572_v35 = vld [vmem:[%s7387_s8 + $0x1d8] ss:$28 sps:$4 sm:$0xff]  }
 0x39f   :  { %4061 = vmatprep.subr.bf16.mxu1 %v5507_v38  ;;  %v5573_v37 = vld [vmem:[%s7387_s8 + $0x558] ss:$28 sps:$4 sm:$0xff]  }
 0x3a0   :  { %v5574_v38 = vld [vmem:[%s7387_s8 + $0x18] ss:$28 sps:$4 sm:$0xff]  }
 0x3a1   :  { %4021 = vmatpush2.bf16.msra.mxu0 %v5502_v13  ;;  %v5575_v13 = vld [vmem:[%s7387_s8 + $0x398] ss:$28 sps:$4 sm:$0xff]  }
 0x3a2   :  { %4062 = vmatpush2.bf16.msra.mxu1 %v5505_v39  ;;  %4022 = vmatprep.subr.bf16.mxu0 %v5510_v40  ;;  %v7359_v39 = vld [vmem:[%s7388_s9] sm:$0x7f] }
 0x3a3   :  { %4063 = vmatprep.subr.bf16.mxu1 %v5513_v41  ;;  %v2654_v40 = vrot.slane %v7359_v39, %v6523_v34  ;;  %v2658_v41 = vrot.slane %v7359_v39, %v6529_v36 }
 0x3a5   :  { %4023 = vmatpush2.bf16.msra.mxu0 %v5508_v42 }
 0x3a6   :  { %4064 = vmatpush2.bf16.msra.mxu1 %v5511_v43  ;;  %4024 = vmatprep.subr.bf16.mxu0 %v5516_v44 }
 0x3a7   :  { %4065 = vmatprep.subr.bf16.mxu1 %v5519_v45 }
 0x3a9   :  { %4025 = vmatpush2.bf16.msra.mxu0 %v5514_v46 }
 0x3aa   :  { %4066 = vmatpush2.bf16.msra.mxu1 %v5517_v47  ;;  %4026 = vmatprep.subr.bf16.mxu0 %v5522_v50 }
 0x3ab   :  { %4067 = vmatprep.subr.bf16.mxu1 %v5525_v52 }
 0x3ad   :  { %4027 = vmatpush2.bf16.msra.mxu0 %v5520_v55 }
 0x3ae   :  { %4068 = vmatpush2.bf16.msra.mxu1 %v5523_v56  ;;  %4028 = vmatprep.subr.bf16.mxu0 %v5528_v57 }
 0x3af   :  { %4069 = vmatprep.subr.bf16.mxu1 %v5531_v58 }
 0x3b1   :  { %4029 = vmatpush2.bf16.msra.mxu0 %v5526_v59 }
 0x3b2   :  { %4070 = vmatpush2.bf16.msra.mxu1 %v5529_v62  ;;  %4030 = vmatprep.subr.bf16.mxu0 %v5534_v63 }
 0x3b3   :  { %4071 = vmatprep.subr.bf16.mxu1 %v5537_v0 }
 0x3b5   :  { %4031 = vmatpush2.bf16.msra.mxu0 %v5532_v1  ;;  %v2662_v1 = vrot.slane %v7359_v39, %v6535_v60 }
 0x3b6   :  { %4072 = vmatpush2.bf16.msra.mxu1 %v5535_v2  ;;  %4032 = vmatprep.subr.bf16.mxu0 %v5540_v3  ;;  %v2666_v2 = vrot.slane %v7359_v39, %v6538_v61 }
 0x3b7   :  { %4073 = vmatprep.subr.bf16.mxu1 %v5543_v4 }
 0x3b9   :  { %4033 = vmatpush2.bf16.msra.mxu0 %v5538_v5 }
 0x3ba   :  { %4074 = vmatpush2.bf16.msra.mxu1 %v5541_v8  ;;  %4765 = vmatprep.subr.bf16.mxu0 %v5544_v9 }
 0x3bb   :  { %4787 = vmatprep.subr.bf16.mxu1 %v5545_v10 }
 0x3bc   :  { %4035 = vmatmul.mubr.bf16.vlgmr.msra.gmra.mxu0 %v6868_v53 }
 0x3bd   :  { %4076 = vmatmul.mubr.bf16.vlgmr.msra.gmra.mxu1 %v6870_v54  ;;  %4766 = vmatpush3.bf16.msra.mxu0 %v5546_v11 }
 0x3be   :  { %4116 = vmatprep.mubr.bf16.mxu0 %v6858_v48  ;;  %4788 = vmatpush3.bf16.msra.mxu1 %v5547_v12  ;;  %v5554_v48 = vld [vmem:[%s7387_s8 + $0x130] ss:$28 sps:$4 sm:$0xff]  }
 0x3bf   :  { %4156 = vmatprep.mubr.bf16.mxu1 %v6860_v49  ;;  %4767 = vmatprep.subr.bf16.mxu0 %v5548_v15  ;;  %v5556_v49 = vld [vmem:[%s7387_s8 + $0x2b8] ss:$28 sps:$4 sm:$0xff]   ;;  %s5630_s8 = smov [#allocation2]  }
 0x3c0   :  { %4789 = vmatprep.subr.bf16.mxu1 %v5549_v16  ;;  %s4221_s9 = sshll.u32 %s5630_s8, 4  ;;  %s4222_s9 = int_to_ptr.vmem [resolvable:$true] %s4221_s9 }
 0x3c1   :  { %4768 = vmatpush3.bf16.msra.mxu0 %v5550_v17  ;;  %s5607_s30 = scalar_lea.vmem %s4222_s9, 896  ;;  %p5612_p1 = scmp.lt.s32.totalorder %s4222_s9, %s4222_s9 }
 0x3c2   :  { %4790 = vmatpush3.bf16.msra.mxu1 %v5551_v18  ;;  %4769 = vmatprep.subr.bf16.mxu0 %v5552_v19  ;;  %p5608_p0 = scmp.ne.s32.totalorder %s4222_s9, %s5607_s30  ;;  %p5613_p2 = scmp.lt.s32.totalorder %s5607_s30, %s5607_s30 }
 0x3c3   :  { %4791 = vmatprep.subr.bf16.mxu1 %v5553_v20 }
 0x3c4   :  { %p5614_p3 = por %p5613_p2, %p5612_p1 }
 0x3c5   :  { %4770 = vmatpush3.bf16.msra.mxu0 %v5554_v48 }
 0x3c6   :  { %4792 = vmatpush3.bf16.msra.mxu1 %v5555_v21  ;;  %4771 = vmatprep.subr.bf16.mxu0 %v5556_v49  ;;  %p5615_p4 = pnand %p5614_p3, %p5608_p0 }
 0x3c7   :  { %4793 = vmatprep.subr.bf16.mxu1 %v5557_v22 }
 0x3c9   :  { %4772 = vmatpush3.bf16.msra.mxu0 %v5558_v23  ;;  %v2669_v23 = vsub.s32 4, %v6520_v33 }
 0x3ca   :  { %4794 = vmatpush3.bf16.msra.mxu1 %v5559_v24  ;;  %4773 = vmatprep.subr.bf16.mxu0 %v5560_v7  ;;  %v2673_v24 = vsub.s32 5, %v6520_v33 }
 0x3cb   :  { %4795 = vmatprep.subr.bf16.mxu1 %v5561_v25  ;;  %v2670_v7 = vrot.slane %v7359_v39, %v2669_v23 }
 0x3cc   :  { %v2674_v25 = vrot.slane %v7359_v39, %v2673_v24 }
 0x3cd   :  { %4774 = vmatpush3.bf16.msra.mxu0 %v5562_v26 }
 0x3ce   :  { %4796 = vmatpush3.bf16.msra.mxu1 %v5563_v27  ;;  %4775 = vmatprep.subr.bf16.mxu0 %v5564_v14 }
 0x3cf   :  { %4797 = vmatprep.subr.bf16.mxu1 %v5565_v51 }
 0x3d1   :  { %4776 = vmatpush3.bf16.msra.mxu0 %v5566_v28 }
 0x3d2   :  { %4798 = vmatpush3.bf16.msra.mxu1 %v5567_v29  ;;  %4777 = vmatprep.subr.bf16.mxu0 %v5568_v30 }
 0x3d3   :  { %4799 = vmatprep.subr.bf16.mxu1 %v5569_v6 }
 0x3d5   :  { %4778 = vmatpush3.bf16.msra.mxu0 %v5570_v31 }
 0x3d6   :  { %4800 = vmatpush3.bf16.msra.mxu1 %v5571_v32  ;;  %4779 = vmatprep.subr.bf16.mxu0 %v5572_v35 }
 0x3d7   :  { %4801 = vmatprep.subr.bf16.mxu1 %v5573_v37 }
 0x3d9   :  { %4780 = vmatpush3.bf16.msra.mxu0 %v5574_v38 }
 0x3da   :  { %4802 = vmatpush3.bf16.msra.mxu1 %v5575_v13 }
 0x3dc   :  { %4117 = vmatmul.mubr.bf16.vlgmr.msra.gmra.mxu0 %v6868_v53 }
 0x3dd   :  { %4157 = vmatmul.mubr.bf16.vlgmr.msra.gmra.mxu1 %v6870_v54 }
 0x3fc   :  { %v3872_v42 = vpop.f32.mrf.mxu0  ;;  %v3913_v43 = vpop.f32.mrf.mxu1 }
 0x3fd   :  { %v3873_v44 = vadd.f32 %v3872_v42, %v2654_v40 }
 0x3fe   :  { %v3874_v45 = vpop.f32.mrf.mxu0  ;;  %v3915_v46 = vpop.f32.mrf.mxu1 }
 0x3ff   :  { %v3914_v47 = vadd.f32 %v3913_v43, %v3873_v44  ;;  %v3875_v53 = vadd.f32 %v3874_v45, %v2658_v41  ;;  %v2677_v44 = vsub.s32 6, %v6520_v33 }
 0x400   :  { %v3876_v50 = vpop.f32.mrf.mxu0  ;;  %v3917_v54 = vpop.f32.mrf.mxu1 }
 0x401   :  { %v4758_v52 = vmul.f32 -1.442695, %v3914_v47  ;;  %v3916_v55 = vadd.f32 %v3915_v46, %v3875_v53  ;;  %v2678_v47 = vrot.slane %v7359_v39, %v2677_v44 }
 0x402   :  { %v3877_v56 = vpop.f32.mrf.mxu0  ;;  %v3918_v57 = vpop.f32.mrf.mxu1 }
 0x403   :  { %5578 = vpow2.f32 %v4758_v52  ;;  %v4759_v58 = vmul.f32 -1.442695, %v3916_v55 }
 0x405   :  { %5580 = vpow2.f32 %v4759_v58 }
 0x410   :  { %v5579_v34 = vpop.eup %5578 }
 0x411   :  { %v4185_v59 = vadd.f32 1.0, %v5579_v34 }
 0x412   :  { %v5581_v62 = vpop.eup %5580 }
 0x413   :  { %5582 = vrcp.f32 %v4185_v59  ;;  %v4186_v36 = vadd.f32 1.0, %v5581_v62 }
 0x415   :  { %5584 = vrcp.f32 %v4186_v36 }
 0x420   :  { %v5583_v63 = vpop.eup %5582 }
 0x421   :  { %4206 = vst [vmem:[#allocation2] sm:$0xff] %v5583_v63 }
 0x422   :  { %v5585_v0 = vpop.eup %5584 }
 0x423   :  { %4207 = vst [vmem:[#allocation2 + $0x8] sm:$0xff] %v5585_v0 }
 0x43c   :  { %v3954_v3 = vpop.f32.mrf.mxu0  ;;  %v3995_v4 = vpop.f32.mrf.mxu1 }
 0x43d   :  { %v3955_v5 = vadd.f32 %v3954_v3, %v2662_v1 }
 0x43e   :  { %v3956_v8 = vpop.f32.mrf.mxu0  ;;  %v3997_v9 = vpop.f32.mrf.mxu1 }
 0x43f   :  { %v3996_v10 = vadd.f32 %v3995_v4, %v3955_v5  ;;  %v3957_v11 = vadd.f32 %v3956_v8, %v2666_v2 }
 0x440   :  { %v3958_v12 = vpop.f32.mrf.mxu0  ;;  %v3999_v15 = vpop.f32.mrf.mxu1 }
 0x441   :  { %v4760_v16 = vmul.f32 -1.442695, %v3996_v10  ;;  %v3998_v17 = vadd.f32 %v3997_v9, %v3957_v11 }
 0x442   :  { %v3959_v18 = vpop.f32.mrf.mxu0  ;;  %v4000_v19 = vpop.f32.mrf.mxu1 }
 0x443   :  { %5586 = vpow2.f32 %v4760_v16  ;;  %v4761_v20 = vmul.f32 -1.442695, %v3998_v17 }
 0x445   :  { %5588 = vpow2.f32 %v4761_v20 }
 0x450   :  { %v5587_v60 = vpop.eup %5586 }
 0x451   :  { %v4187_v48 = vadd.f32 1.0, %v5587_v60 }
 0x452   :  { %v5589_v21 = vpop.eup %5588 }
 0x453   :  { %5590 = vrcp.f32 %v4187_v48  ;;  %v4188_v61 = vadd.f32 1.0, %v5589_v21 }
 0x455   :  { %5592 = vrcp.f32 %v4188_v61 }
 0x460   :  { %v5591_v49 = vpop.eup %5590 }
 0x461   :  { %4208 = vst [vmem:[#allocation2 + $0x10] sm:$0xff] %v5591_v49 }
 0x462   :  { %v5593_v22 = vpop.eup %5592 }
 0x463   :  { %4209 = vst [vmem:[#allocation2 + $0x18] sm:$0xff] %v5593_v22 }
 0x47c   :  { %v4036_v26 = vpop.f32.mrf.mxu0 }
 0x47d   :  { %v4037_v27 = vadd.f32 %v4036_v26, %v2670_v7  ;;  %v4077_v14 = vpop.f32.mrf.mxu1 }
 0x47e   :  { %v4038_v51 = vpop.f32.mrf.mxu0 }
 0x47f   :  { %v4078_v28 = vadd.f32 %v4077_v14, %v4037_v27  ;;  %v4039_v29 = vadd.f32 %v4038_v51, %v2674_v25  ;;  %v4079_v30 = vpop.f32.mrf.mxu1 }
 0x480   :  { %v4040_v6 = vpop.f32.mrf.mxu0 }
 0x481   :  { %v4762_v31 = vmul.f32 -1.442695, %v4078_v28  ;;  %v4080_v32 = vadd.f32 %v4079_v30, %v4039_v29  ;;  %v4081_v35 = vpop.f32.mrf.mxu1 }
 0x482   :  { %v4041_v37 = vpop.f32.mrf.mxu0 }
 0x483   :  { %5594 = vpow2.f32 %v4762_v31  ;;  %v4763_v38 = vmul.f32 -1.442695, %v4080_v32  ;;  %v4082_v13 = vpop.f32.mrf.mxu1 }
 0x485   :  { %5596 = vpow2.f32 %v4763_v38 }
 0x490   :  { %v5595_v40 = vpop.eup %5594 }
 0x491   :  { %v4189_v41 = vadd.f32 1.0, %v5595_v40 }
 0x492   :  { %v5597_v42 = vpop.eup %5596 }
 0x493   :  { %5598 = vrcp.f32 %v4189_v41  ;;  %v4190_v43 = vadd.f32 1.0, %v5597_v42 }
 0x495   :  { %5600 = vrcp.f32 %v4190_v43 }
 0x49c   :  { %v4781_v45 = vpop.f32.mrf.mxu0 }
 0x49d   :  { %v4803_v46 = vpop.f32.mrf.mxu1 }
 0x49e   :  { %v4782_v53 = vpop.f32.mrf.mxu0 }
 0x49f   :  { %v4783_v50 = vadd.f32 %v4782_v53, %v4781_v45  ;;  %v4804_v54 = vpop.f32.mrf.mxu1 }
 0x4a0   :  { %v5599_v52 = vpop.eup %5598  ;;  %v4784_v55 = vpop.f32.mrf.mxu0  ;;  %v4805_v57 = vadd.f32 %v4804_v54, %v4803_v46 }
 0x4a1   :  { %4210 = vst [vmem:[#allocation2 + $0x20] sm:$0xff] %v5599_v52  ;;  %v4119_v56 = vadd.f32 %v4783_v50, %v2678_v47  ;;  %v4806_v58 = vpop.f32.mrf.mxu1 }
 0x4a2   :  { %v5601_v34 = vpop.eup %5600  ;;  %v4785_v59 = vpop.f32.mrf.mxu0 }
 0x4a3   :  { %4211 = vst [vmem:[#allocation2 + $0x28] sm:$0xff] %v5601_v34  ;;  %v4159_v62 = vadd.f32 %v4805_v57, %v4119_v56  ;;  %v4807_v36 = vpop.f32.mrf.mxu1 }
 0x4a5   :  { %v4764_v63 = vmul.f32 -1.442695, %v4159_v62 }
 0x4a7   :  { %5602 = vpow2.f32 %v4764_v63 }
 0x4b4   :  { %v5603_v33 = vpop.eup %5602 }
 0x4b5   :  { %v4191_v0 = vadd.f32 1.0, %v5603_v33 }
 0x4b7   :  { %5604 = vrcp.f32 %v4191_v0 }
 0x4c4   :  { %v5605_v39 = vpop.eup %5604 }
 0x4c5   :  { %4212 = vst.msk [vmem:[#allocation2 + $0x30] sm:$0xff] %vm1265_vm0, %v5605_v39 }
 0x4c6   :  { %5618 = shalt.err (!%p5615_p4)
}
 0x4c7   :  { %4224 = dma.vmem_to_hbm [thread:$0]  %s4222_s9, 896, %s7389_s10, [#allocation3]  }
 0x4c8   :  { %5627 = dma.done.wait [#allocation3], 896  }
 0x4c9   :  { %5628 = vsyncadd [#allocation3], 4294966400 }
 0x4ca   :  { %4232 = vsyncpa [#allocation3], 1 }

</bundles_post_ra>
